<compile_context>
chip_gen: v7x
topology: tpu7x:2x2x1
jax: 0.10.0
libtpu: 0.0.40
codegen_flags: <defaults>
</compile_context>

<pallas_src>
import math

import jax
import jax.numpy as jnp
from jax import lax
from jax.experimental import pallas as pl
from jax.experimental.pallas import tpu as pltpu

COS_EPS = 1e-8    # F.cosine_similarity eps
LOG_EPS = 1e-10   # matches the reference's log(... + 1e-10)
NEG_BIG = -1e30   # finite stand-in for -inf (keeps all arithmetic NaN-free)


def _round_up(x, m):
    return ((x + m - 1) // m) * m


def _normalize_features(features, temperature):
    """L2-normalize rows and fold 1/sqrt(T) into each operand so that the NT
    matmul of the result directly yields cosine_similarity / temperature."""
    f = features.astype(jnp.float32)
    norms = jnp.maximum(jnp.sqrt(jnp.sum(f * f, axis=1, keepdims=True)), COS_EPS)
    return (f / norms) * jnp.float32(1.0 / math.sqrt(temperature))


def _supcon_kernel(fq_ref, fk_ref, lq_ref, lk_ref, vrow_ref, vcol_ref,
                   out_ref, m_ref, sneg_ref, pdot_ref, pcnt_ref):
    qi = pl.program_id(0)
    ki = pl.program_id(1)
    nk = pl.num_programs(1)

    @pl.when(ki == 0)
    def _init():
        m_ref[...] = jnp.full(m_ref.shape, NEG_BIG, jnp.float32)
        sneg_ref[...] = jnp.zeros_like(sneg_ref)
        pdot_ref[...] = jnp.zeros_like(pdot_ref)
        pcnt_ref[...] = jnp.zeros_like(pcnt_ref)

    vrow = vrow_ref[...]            # (TQ, 1) f32, query-row validity
    vcol = vcol_ref[...]            # (1, TK) f32, key-column validity

    # NT matmul on the MXU; 1/temperature is already folded into the operands.
    sim = lax.dot_general(fq_ref[...], fk_ref[...],
                          (((1,), (1,)), ((), ())),
                          preferred_element_type=jnp.float32)   # (TQ, TK) f32

    # Running row max over *valid* key columns (diagonal included, as in ref).
    tile_max = jnp.max(jnp.where(vcol > 0.0, sim, NEG_BIG), axis=1, keepdims=True)
    m_prev = m_ref[...]
    m_new = jnp.maximum(m_prev, tile_max)

    # pair_valid * offdiag, built once and reused for both masks.  The iota
    # compare is computed unconditionally: gating it on diagonal tiles would
    # need a value-dependent branch, and its cost is negligible vs the matmul.
    tq, tk = sim.shape
    row_g = qi * tq + lax.broadcasted_iota(jnp.int32, (tq, tk), 0)
    col_g = ki * tk + lax.broadcasted_iota(jnp.int32, (tq, tk), 1)
    base = jnp.where(row_g != col_g, vrow * vcol, 0.0)           # (TQ, TK)

    # Label agreement (kept as a per-tile NT matmul to support multi-hot
    # labels, matching torch.mm(labels, labels.T); C is tiny).
    dot_lab = lax.dot_general(lq_ref[...], lk_ref[...],
                              (((1,), (1,)), ((), ())),
                              preferred_element_type=jnp.float32)
    mask_pos = dot_lab * base
    mask_neg = jnp.where(dot_lab == 0.0, base, mask_pos)   # (dot==0 ? 1 : dot)*base

    # Online (rescaled) accumulation of the negative denominator.  Wherever
    # mask_neg > 0 the column is valid, hence sim - m_new <= 0 there; the
    # minimum-clamp only protects invalid columns (which are zeroed anyway)
    # from producing inf before the multiply.
    rescale = jnp.exp(m_prev - m_new)                                  # (TQ, 1)
    p = jnp.exp(jnp.minimum(sim - m_new, 0.0))
    sneg_ref[...] = sneg_ref[...] * rescale + jnp.sum(p * mask_neg, axis=1,
                                                      keepdims=True)

    # Positive term is linear in sim: accumulate sum(sim*mask) and sum(mask),
    # then subtract sim_max * count at finalize (== sum((sim - sim_max)*mask)).
    pdot_ref[...] += jnp.sum(sim * mask_pos, axis=1, keepdims=True)
    pcnt_ref[...] += jnp.sum(mask_pos, axis=1, keepdims=True)
    m_ref[...] = m_new

    @pl.when(ki == nk - 1)
    def _finalize():
        pos = pdot_ref[...] - m_ref[...] * pcnt_ref[...]
        log_neg = jnp.log(sneg_ref[...] + LOG_EPS)
        out_ref[...] = (log_neg - pos) * vrow      # per-row loss, invalid rows -> 0


def supcon_loss(features, labels, mask, *, temperature=0.5,
                tq=256, tk=512, feature_dtype=jnp.bfloat16):
    """features: (B, Z), labels: (B, C) one/multi-hot, mask: (B, 1) of 0/1."""
    B, Z = features.shape
    C = labels.shape[1]

    valid = mask.reshape(B, 1).astype(jnp.float32)
    lab = labels.astype(jnp.float32)
    # Pre-normalized, temperature-folded features; bf16 feeds the MXU at full
    # rate (cosine similarity is bounded, accumulation stays in f32).
    fn = _normalize_features(features, temperature).astype(feature_dtype)

    # Pad the batch so every (TQ, TK) tile is full; padded rows have mask == 0,
    # zero features and zero labels, so they contribute nothing.
    b128 = max(128, _round_up(B, 128))
    tq = min(tq, b128)
    tk = min(tk, b128)
    bp = _round_up(b128, math.lcm(tq, tk))
    pad = bp - B
    if pad:
        fn = jnp.pad(fn, ((0, pad), (0, 0)))
        lab = jnp.pad(lab, ((0, pad), (0, 0)))
        valid = jnp.pad(valid, ((0, pad), (0, 0)))
    valid_col = valid.reshape(1, bp)

    nq = bp // tq
    nk = bp // tk

    # Advisory cost hint for XLA's scheduler around the custom call.
    cost = pl.CostEstimate(
        flops=2 * bp * bp * (Z + C) + 12 * bp * bp,
        transcendentals=bp * bp,
        bytes_accessed=(nq + nk) * bp * (Z * jnp.dtype(feature_dtype).itemsize
                                         + 4 * C) + 8 * bp,
    )

    per_row = pl.pallas_call(
        _supcon_kernel,
        out_shape=jax.ShapeDtypeStruct((bp, 1), jnp.float32),
        grid_spec=pltpu.PrefetchScalarGridSpec(
            num_scalar_prefetch=0,
            grid=(nq, nk),                                       # key axis last (reduction)
            in_specs=[
                pl.BlockSpec((tq, Z), lambda qi, ki: (qi, 0)),   # query features
                pl.BlockSpec((tk, Z), lambda qi, ki: (ki, 0)),   # key features
                pl.BlockSpec((tq, C), lambda qi, ki: (qi, 0)),   # query labels
                pl.BlockSpec((tk, C), lambda qi, ki: (ki, 0)),   # key labels
                pl.BlockSpec((tq, 1), lambda qi, ki: (qi, 0)),   # query validity
                pl.BlockSpec((1, tk), lambda qi, ki: (0, ki)),   # key validity
            ],
            out_specs=pl.BlockSpec((tq, 1), lambda qi, ki: (qi, 0)),
            scratch_shapes=[pltpu.VMEM((tq, 1), jnp.float32)] * 4,  # m, s_neg, pos_dot, pos_cnt
        ),
        compiler_params=pltpu.CompilerParams(
            dimension_semantics=("parallel", "arbitrary"),       # megacore on v7x
            vmem_limit_bytes=32 * 1024 * 1024,                   # raise for bigger tiles
        ),
        cost_estimate=cost,
    )(fn, fn, lab, lab, valid, valid_col)

    # Same degenerate behaviour as the reference (NaN if mask.sum() == 0).
    return jnp.sum(per_row) / jnp.sum(valid)


def _supcon_loss_ref(features, labels, mask, temperature=0.5,
                     feature_dtype=jnp.float32):
    """Pure-JAX mirror of the PyTorch module (mask-restricted reductions are
    equivalent to masked_select).  feature_dtype=bf16 reproduces the kernel's
    operand rounding for a tight comparison."""
    valid = mask.reshape(-1, 1).astype(jnp.float32)
    lab = labels.astype(jnp.float32)
    fn = _normalize_features(features, temperature).astype(feature_dtype)
    fn = fn.astype(jnp.float32)
    sim = jnp.dot(fn, fn.T, precision=lax.Precision.HIGHEST)
    valid_col = valid.T
    pair = valid * valid_col
    sim_max = jnp.max(jnp.where(valid_col > 0, sim, NEG_BIG), axis=1, keepdims=True)
    sim_sub = sim - sim_max
    dot_lab = jnp.dot(lab, lab.T, precision=lax.Precision.HIGHEST)
    offdiag = 1.0 - jnp.eye(fn.shape[0], dtype=jnp.float32)
    mask_pos = dot_lab * pair * offdiag
    mask_neg = jnp.where(dot_lab == 0.0, 1.0, dot_lab) * pair * offdiag
    pos = jnp.sum(sim_sub * mask_pos, axis=1, keepdims=True)
    log_exp_neg = jnp.log(
        jnp.sum(jnp.exp(jnp.minimum(sim_sub, 0.0)) * mask_neg, axis=1,
                keepdims=True) + LOG_EPS)
    per_row = -(pos - log_exp_neg)
    return jnp.sum(per_row * valid) / jnp.sum(valid)


if __name__ == "__main__":
    key = jax.random.PRNGKey(0)
    k1, k2, k3 = jax.random.split(key, 3)

    # --- small smoke test (B=8 pads to 128 -> single grid tile) ---
    B, Z, C = 8, 32, 4
    features = jax.random.normal(k1, (B, Z), dtype=jnp.float32)
    labels = jax.nn.one_hot(jax.random.randint(k2, (B,), 0, C), C, dtype=jnp.float32)
    mask = jnp.array([[1.0], [1.0], [0.0], [1.0], [1.0], [0.0], [1.0], [1.0]],
                     dtype=jnp.float32)

    loss = supcon_loss(features, labels, mask)
    jax.block_until_ready(loss)

    ref_bf16 = _supcon_loss_ref(features, labels, mask, feature_dtype=jnp.bfloat16)
    ref_f32 = _supcon_loss_ref(features, labels, mask)
    assert jnp.allclose(loss, ref_bf16, rtol=1e-3, atol=1e-3), (loss, ref_bf16)
    assert jnp.allclose(loss, ref_f32, rtol=3e-2, atol=3e-2), (loss, ref_f32)

    # --- multi-tile test: exercises online accumulation across key tiles and
    #     the parallel query axis (B=272 pads to 384 -> grid (3, 3)) ---
    k4, k5, k6 = jax.random.split(k3, 3)
    B2, Z2, C2 = 272, 64, 5
    feats2 = jax.random.normal(k4, (B2, Z2), dtype=jnp.float32)
    labels2 = jax.nn.one_hot(jax.random.randint(k5, (B2,), 0, C2), C2,
                             dtype=jnp.float32)
    mask2 = (jax.random.uniform(k6, (B2, 1)) > 0.2).astype(jnp.float32)

    loss2 = supcon_loss(feats2, labels2, mask2, tq=128, tk=128)
    jax.block_until_ready(loss2)

    ref2_bf16 = _supcon_loss_ref(feats2, labels2, mask2, feature_dtype=jnp.bfloat16)
    ref2_f32 = _supcon_loss_ref(feats2, labels2, mask2)
    assert jnp.allclose(loss2, ref2_bf16, rtol=1e-3, atol=1e-3), (loss2, ref2_bf16)
    assert jnp.allclose(loss2, ref2_f32, rtol=3e-2, atol=3e-2), (loss2, ref2_f32)

    print("KERNEL_OK")
</pallas_src>

<mosaic_0001>
module attributes {stable_mosaic.version = 11 : i64} {
  func.func @_supcon_kernel(%arg0: i32, %arg1: i32, %arg2: memref<128x32xbf16, #tpu.memory_space<vmem>>, %arg3: memref<128x32xbf16, #tpu.memory_space<vmem>>, %arg4: memref<128x4xf32, #tpu.memory_space<vmem>>, %arg5: memref<128x4xf32, #tpu.memory_space<vmem>>, %arg6: memref<128x1xf32, #tpu.memory_space<vmem>>, %arg7: memref<1x128xf32, #tpu.memory_space<vmem>>, %arg8: memref<128x1xf32, #tpu.memory_space<vmem>>, %arg9: memref<128x1xf32, #tpu.memory_space<vmem>>, %arg10: memref<128x1xf32, #tpu.memory_space<vmem>>, %arg11: memref<128x1xf32, #tpu.memory_space<vmem>>, %arg12: memref<128x1xf32, #tpu.memory_space<vmem>>) attributes {dimension_semantics = [#tpu.dimension_semantics<parallel>, #tpu.dimension_semantics<arbitrary>], iteration_bounds = array<i64: 1, 1>, scalar_prefetch = 0 : i64, scratch_operands = 4 : i64, tpu.core_type = #tpu.core_type<tc>, window_params = [{transform_indices = @transform_0, window_bounds = array<i64: 128, 32>}, {transform_indices = @transform_1, window_bounds = array<i64: 128, 32>}, {transform_indices = @transform_2, window_bounds = array<i64: 128, 4>}, {transform_indices = @transform_3, window_bounds = array<i64: 128, 4>}, {transform_indices = @transform_4, window_bounds = array<i64: 128, 1>}, {transform_indices = @transform_5, window_bounds = array<i64: 1, 128>}, {transform_indices = @transform_6, window_bounds = array<i64: 128, 1>}]} {
    %c0_i32 = arith.constant 0 : i32
    %0 = arith.cmpi eq, %arg1, %c0_i32 : i32
    %1 = arith.extui %0 : i1 to i32
    %c0_i32_0 = arith.constant 0 : i32
    %2 = arith.cmpi ne, %1, %c0_i32_0 : i32
    scf.if %2 {
      %cst_41 = arith.constant -1.000000e+30 : f32
      %68 = vector.broadcast %cst_41 : f32 to vector<128x1xf32>
      %c0_42 = arith.constant 0 : index
      %c0_43 = arith.constant 0 : index
      %69 = vector.load %arg9[%c0_42, %c0_43] : memref<128x1xf32, #tpu.memory_space<vmem>>, vector<128x1xf32>
      tpu.vector_store %arg9[%c0_42, %c0_43], %68 {strides = array<i32>} : memref<128x1xf32, #tpu.memory_space<vmem>>, vector<128x1xf32>,
      %cst_44 = arith.constant 0.000000e+00 : f32
      %70 = vector.broadcast %cst_44 : f32 to vector<128x1xf32>
      %c0_45 = arith.constant 0 : index
      %c0_46 = arith.constant 0 : index
      %71 = vector.load %arg10[%c0_45, %c0_46] : memref<128x1xf32, #tpu.memory_space<vmem>>, vector<128x1xf32>
      tpu.vector_store %arg10[%c0_45, %c0_46], %70 {strides = array<i32>} : memref<128x1xf32, #tpu.memory_space<vmem>>, vector<128x1xf32>,
      %cst_47 = arith.constant 0.000000e+00 : f32
      %72 = vector.broadcast %cst_47 : f32 to vector<128x1xf32>
      %c0_48 = arith.constant 0 : index
      %c0_49 = arith.constant 0 : index
      %73 = vector.load %arg11[%c0_48, %c0_49] : memref<128x1xf32, #tpu.memory_space<vmem>>, vector<128x1xf32>
      tpu.vector_store %arg11[%c0_48, %c0_49], %72 {strides = array<i32>} : memref<128x1xf32, #tpu.memory_space<vmem>>, vector<128x1xf32>,
      %cst_50 = arith.constant 0.000000e+00 : f32
      %74 = vector.broadcast %cst_50 : f32 to vector<128x1xf32>
      %c0_51 = arith.constant 0 : index
      %c0_52 = arith.constant 0 : index
      %75 = vector.load %arg12[%c0_51, %c0_52] : memref<128x1xf32, #tpu.memory_space<vmem>>, vector<128x1xf32>
      tpu.vector_store %arg12[%c0_51, %c0_52], %74 {strides = array<i32>} : memref<128x1xf32, #tpu.memory_space<vmem>>, vector<128x1xf32>,
    } else {
    }
    %c0 = arith.constant 0 : index
    %c0_1 = arith.constant 0 : index
    %3 = vector.load %arg6[%c0, %c0_1] : memref<128x1xf32, #tpu.memory_space<vmem>>, vector<128x1xf32>
    %c0_2 = arith.constant 0 : index
    %c0_3 = arith.constant 0 : index
    %4 = vector.load %arg7[%c0_2, %c0_3] : memref<1x128xf32, #tpu.memory_space<vmem>>, vector<1x128xf32>
    %c0_4 = arith.constant 0 : index
    %c0_5 = arith.constant 0 : index
    %5 = vector.load %arg2[%c0_4, %c0_5] : memref<128x32xbf16, #tpu.memory_space<vmem>>, vector<128x32xbf16>
    %c0_6 = arith.constant 0 : index
    %c0_7 = arith.constant 0 : index
    %6 = vector.load %arg3[%c0_6, %c0_7] : memref<128x32xbf16, #tpu.memory_space<vmem>>, vector<128x32xbf16>
    %cst = arith.constant dense<0.000000e+00> : vector<128x128xf32>
    %7 = tpu.matmul %5, %6, %cst {dimension_numbers = #tpu.dot_dimension_numbers<[1], [1], [0], [0], [0, 0, 1, 0], [], []>} : vector<128x32xbf16>, vector<128x32xbf16>, vector<128x128xf32> -> vector<128x128xf32>
    %cst_8 = arith.constant 0.000000e+00 : f32
    %8 = vector.broadcast %cst_8 : f32 to vector<1x128xf32>
    %9 = arith.cmpf ogt, %4, %8 : vector<1x128xf32>
    %cst_9 = arith.constant -1.000000e+30 : f32
    %10 = vector.shape_cast %9 : vector<1x128xi1> to vector<1x128xi1>
    %11 = vector.broadcast %10 : vector<1x128xi1> to vector<128x128xi1>
    %12 = vector.broadcast %cst_9 : f32 to vector<128x128xf32>
    %13 = arith.select %11, %7, %12 : vector<128x128xi1>, vector<128x128xf32>
    %cst_10 = arith.constant dense<0xFF800000> : vector<128xf32>
    %14 = vector.multi_reduction <maximumf>, %13, %cst_10 [1] : vector<128x128xf32> to vector<128xf32>
    %15 = vector.shape_cast %14 : vector<128xf32> to vector<128x1xf32>
    %c0_11 = arith.constant 0 : index
    %c0_12 = arith.constant 0 : index
    %16 = vector.load %arg9[%c0_11, %c0_12] : memref<128x1xf32, #tpu.memory_space<vmem>>, vector<128x1xf32>
    %17 = arith.maximumf %16, %15 : vector<128x1xf32>
    %c128_i32 = arith.constant 128 : i32
    %18 = arith.muli %arg0, %c128_i32 : i32
    %19 = tpu.iota {dimensions = array<i32: 0>} : vector<128x128xi32>
    %20 = vector.broadcast %18 : i32 to vector<128x128xi32>
    %21 = arith.addi %20, %19 : vector<128x128xi32>
    %c128_i32_13 = arith.constant 128 : i32
    %22 = arith.muli %arg1, %c128_i32_13 : i32
    %23 = tpu.iota {dimensions = array<i32: 1>} : vector<128x128xi32>
    %24 = vector.broadcast %22 : i32 to vector<128x128xi32>
    %25 = arith.addi %24, %23 : vector<128x128xi32>
    %26 = arith.cmpi ne, %21, %25 : vector<128x128xi32>
    %27 = vector.broadcast %3 : vector<128x1xf32> to vector<128x128xf32>
    %28 = vector.broadcast %4 : vector<1x128xf32> to vector<128x128xf32>
    %29 = arith.mulf %27, %28 : vector<128x128xf32>
    %cst_14 = arith.constant 0.000000e+00 : f32
    %30 = vector.broadcast %cst_14 : f32 to vector<128x128xf32>
    %31 = arith.select %26, %29, %30 : vector<128x128xi1>, vector<128x128xf32>
    %c0_15 = arith.constant 0 : index
    %c0_16 = arith.constant 0 : index
    %32 = vector.load %arg4[%c0_15, %c0_16] : memref<128x4xf32, #tpu.memory_space<vmem>>, vector<128x4xf32>
    %c0_17 = arith.constant 0 : index
    %c0_18 = arith.constant 0 : index
    %33 = vector.load %arg5[%c0_17, %c0_18] : memref<128x4xf32, #tpu.memory_space<vmem>>, vector<128x4xf32>
    %cst_19 = arith.constant dense<0.000000e+00> : vector<128x128xf32>
    %34 = tpu.matmul %32, %33, %cst_19 {dimension_numbers = #tpu.dot_dimension_numbers<[1], [1], [0], [0], [0, 0, 1, 0], [], []>} : vector<128x4xf32>, vector<128x4xf32>, vector<128x128xf32> -> vector<128x128xf32>
    %35 = arith.mulf %34, %31 : vector<128x128xf32>
    %cst_20 = arith.constant 0.000000e+00 : f32
    %36 = vector.broadcast %cst_20 : f32 to vector<128x128xf32>
    %37 = arith.cmpf oeq, %34, %36 : vector<128x128xf32>
    %38 = arith.select %37, %31, %35 : vector<128x128xi1>, vector<128x128xf32>
    %39 = arith.subf %16, %17 : vector<128x1xf32>
    %40 = math.exp %39 : vector<128x1xf32>
    %41 = vector.broadcast %17 : vector<128x1xf32> to vector<128x128xf32>
    %42 = arith.subf %7, %41 : vector<128x128xf32>
    %cst_21 = arith.constant 0.000000e+00 : f32
    %43 = vector.broadcast %cst_21 : f32 to vector<128x128xf32>
    %44 = arith.minimumf %42, %43 : vector<128x128xf32>
    %45 = math.exp %44 : vector<128x128xf32>
    %c0_22 = arith.constant 0 : index
    %c0_23 = arith.constant 0 : index
    %46 = vector.load %arg10[%c0_22, %c0_23] : memref<128x1xf32, #tpu.memory_space<vmem>>, vector<128x1xf32>
    %47 = arith.mulf %46, %40 : vector<128x1xf32>
    %48 = arith.mulf %45, %38 : vector<128x128xf32>
    %cst_24 = arith.constant dense<0.000000e+00> : vector<128xf32>
    %49 = vector.multi_reduction <add>, %48, %cst_24 [1] : vector<128x128xf32> to vector<128xf32>
    %50 = vector.shape_cast %49 : vector<128xf32> to vector<128x1xf32>
    %51 = arith.addf %47, %50 : vector<128x1xf32>
    %c0_25 = arith.constant 0 : index
    %c0_26 = arith.constant 0 : index
    %52 = vector.load %arg10[%c0_25, %c0_26] : memref<128x1xf32, #tpu.memory_space<vmem>>, vector<128x1xf32>
    tpu.vector_store %arg10[%c0_25, %c0_26], %51 {strides = array<i32>} : memref<128x1xf32, #tpu.memory_space<vmem>>, vector<128x1xf32>,
    %c0_27 = arith.constant 0 : index
    %c0_28 = arith.constant 0 : index
    %53 = vector.load %arg11[%c0_27, %c0_28] : memref<128x1xf32, #tpu.memory_space<vmem>>, vector<128x1xf32>
    %54 = arith.mulf %7, %35 : vector<128x128xf32>
    %cst_29 = arith.constant dense<0.000000e+00> : vector<128xf32>
    %55 = vector.multi_reduction <add>, %54, %cst_29 [1] : vector<128x128xf32> to vector<128xf32>
    %56 = vector.shape_cast %55 : vector<128xf32> to vector<128x1xf32>
    %57 = arith.addf %53, %56 : vector<128x1xf32>
    %c0_30 = arith.constant 0 : index
    %c0_31 = arith.constant 0 : index
    %58 = vector.load %arg11[%c0_30, %c0_31] : memref<128x1xf32, #tpu.memory_space<vmem>>, vector<128x1xf32>
    tpu.vector_store %arg11[%c0_30, %c0_31], %57 {strides = array<i32>} : memref<128x1xf32, #tpu.memory_space<vmem>>, vector<128x1xf32>,
    %c0_32 = arith.constant 0 : index
    %c0_33 = arith.constant 0 : index
    %59 = vector.load %arg12[%c0_32, %c0_33] : memref<128x1xf32, #tpu.memory_space<vmem>>, vector<128x1xf32>
    %cst_34 = arith.constant dense<0.000000e+00> : vector<128xf32>
    %60 = vector.multi_reduction <add>, %35, %cst_34 [1] : vector<128x128xf32> to vector<128xf32>
    %61 = vector.shape_cast %60 : vector<128xf32> to vector<128x1xf32>
    %62 = arith.addf %59, %61 : vector<128x1xf32>
    %c0_35 = arith.constant 0 : index
    %c0_36 = arith.constant 0 : index
    %63 = vector.load %arg12[%c0_35, %c0_36] : memref<128x1xf32, #tpu.memory_space<vmem>>, vector<128x1xf32>
    tpu.vector_store %arg12[%c0_35, %c0_36], %62 {strides = array<i32>} : memref<128x1xf32, #tpu.memory_space<vmem>>, vector<128x1xf32>,
    %c0_37 = arith.constant 0 : index
    %c0_38 = arith.constant 0 : index
    %64 = vector.load %arg9[%c0_37, %c0_38] : memref<128x1xf32, #tpu.memory_space<vmem>>, vector<128x1xf32>
    tpu.vector_store %arg9[%c0_37, %c0_38], %17 {strides = array<i32>} : memref<128x1xf32, #tpu.memory_space<vmem>>, vector<128x1xf32>,
    %c0_i32_39 = arith.constant 0 : i32
    %65 = arith.cmpi eq, %arg1, %c0_i32_39 : i32
    %66 = arith.extui %65 : i1 to i32
    %c0_i32_40 = arith.constant 0 : i32
    %67 = arith.cmpi ne, %66, %c0_i32_40 : i32
    scf.if %67 {
      %c0_41 = arith.constant 0 : index
      %c0_42 = arith.constant 0 : index
      %68 = vector.load %arg11[%c0_41, %c0_42] : memref<128x1xf32, #tpu.memory_space<vmem>>, vector<128x1xf32>
      %c0_43 = arith.constant 0 : index
      %c0_44 = arith.constant 0 : index
      %69 = vector.load %arg9[%c0_43, %c0_44] : memref<128x1xf32, #tpu.memory_space<vmem>>, vector<128x1xf32>
      %c0_45 = arith.constant 0 : index
      %c0_46 = arith.constant 0 : index
      %70 = vector.load %arg12[%c0_45, %c0_46] : memref<128x1xf32, #tpu.memory_space<vmem>>, vector<128x1xf32>
      %71 = arith.mulf %69, %70 : vector<128x1xf32>
      %72 = arith.subf %68, %71 : vector<128x1xf32>
      %c0_47 = arith.constant 0 : index
      %c0_48 = arith.constant 0 : index
      %73 = vector.load %arg10[%c0_47, %c0_48] : memref<128x1xf32, #tpu.memory_space<vmem>>, vector<128x1xf32>
      %cst_49 = arith.constant 1.000000e-10 : f32
      %74 = vector.broadcast %cst_49 : f32 to vector<128x1xf32>
      %75 = arith.addf %73, %74 : vector<128x1xf32>
      %76 = math.log %75 : vector<128x1xf32>
      %77 = arith.subf %76, %72 : vector<128x1xf32>
      %78 = arith.mulf %77, %3 : vector<128x1xf32>
      %c0_50 = arith.constant 0 : index
      %c0_51 = arith.constant 0 : index
      %79 = vector.load %arg8[%c0_50, %c0_51] : memref<128x1xf32, #tpu.memory_space<vmem>>, vector<128x1xf32>
      tpu.vector_store %arg8[%c0_50, %c0_51], %78 {strides = array<i32>} : memref<128x1xf32, #tpu.memory_space<vmem>>, vector<128x1xf32>,
    } else {
    }
    return
  }
  func.func @transform_0(%arg0: i32, %arg1: i32) -> (i32, i32) {
    %c0_i32 = arith.constant 0 : i32
    %c0_i32_0 = arith.constant 0 : i32
    return %arg0, %c0_i32 : i32, i32
  }
  func.func @transform_1(%arg0: i32, %arg1: i32) -> (i32, i32) {
    %c0_i32 = arith.constant 0 : i32
    %c0_i32_0 = arith.constant 0 : i32
    return %arg1, %c0_i32 : i32, i32
  }
  func.func @transform_2(%arg0: i32, %arg1: i32) -> (i32, i32) {
    %c0_i32 = arith.constant 0 : i32
    %c0_i32_0 = arith.constant 0 : i32
    return %arg0, %c0_i32 : i32, i32
  }
  func.func @transform_3(%arg0: i32, %arg1: i32) -> (i32, i32) {
    %c0_i32 = arith.constant 0 : i32
    %c0_i32_0 = arith.constant 0 : i32
    return %arg1, %c0_i32 : i32, i32
  }
  func.func @transform_4(%arg0: i32, %arg1: i32) -> (i32, i32) {
    %c0_i32 = arith.constant 0 : i32
    %c0_i32_0 = arith.constant 0 : i32
    return %arg0, %c0_i32 : i32, i32
  }
  func.func @transform_5(%arg0: i32, %arg1: i32) -> (i32, i32) {
    %c0_i32 = arith.constant 0 : i32
    %c0_i32_0 = arith.constant 0 : i32
    return %c0_i32, %arg1 : i32, i32
  }
  func.func @transform_6(%arg0: i32, %arg1: i32) -> (i32, i32) {
    %c0_i32 = arith.constant 0 : i32
    %c0_i32_0 = arith.constant 0 : i32
    return %arg0, %c0_i32 : i32, i32
  }
}

</mosaic_0001>

<bundles_post_ra>
// kernel: tpu_custom_call.1
= control target key start
LH: loop header
LB: loop body
LE: loop exit
PB: predicated region body
PF: predicated region fallthrough
CT: control target
= control target key end

     0   :  { %vm222_vm0 = vcmask 261120   ;;  %vm661_vm1 = vcmask 31744   ;;  %v2028_v1 = vmov 0   ;;  %vm28_vm3 = vcmask 7168   ;;  %s3147_s1 = inlined_call_operand.vmem [shape: bf16[128,32], index: 1, kind: input, shape index: {}]   ;;  %s3148_s3 = inlined_call_operand.vmem [shape: f32[128,4], index: 3, kind: input, shape index: {}]   ;;  %s3149_s0 = inlined_call_operand.vmem [shape: bf16[128,32], index: 0, kind: input, shape index: {}]   ;;  %s3150_s2 = inlined_call_operand.vmem [shape: f32[128,4], index: 2, kind: input, shape index: {}]   ;;  %s3151_s4 = inlined_call_operand.vmem [shape: f32[128,1], index: 4, kind: input, shape index: {}]   ;;  %s3152_s5 = inlined_call_operand.vmem [shape: f32[1,128], index: 5, kind: input, shape index: {}]   ;;  %s3153_s6 = inlined_call_operand.vmem [shape: f32[128,1], index: 6, kind: output, shape index: {}]  }
   0x1   :  { %v1900_v0 = vld [vmem:[%s3147_s1] sm:$0xff]   ;;  %1899 = vset.pattern.permute.xlu1 %v2028_v1  ;;  %1898 = vset.pattern.permute.xlu0 %v2028_v1  ;;  %v646_v3 = vld [vmem:[%s3148_s3 + $0x8] sm:$0xff]  ;;  %vm2079_vm2 = vmpackc.low %vm661_vm1, %vm661_vm1 }
   0x2   :  { %v645_v2 = vld [vmem:[%s3148_s3] sm:$0xff]  ;;  %1887 = vmatprep.subr.msk.bf16.mxu0 %vm222_vm0, %v1900_v0  ;;  %v248_v6 = vsel %vm222_vm0, %v1900_v0, 0  ;;  %v1901_v7 = vld [vmem:[%s3147_s1 + $0x8] sm:$0xff]   ;;  %v647_v8 = vld [vmem:[%s3148_s3 + $0x10] sm:$0xff] }
   0x3   :  { %v1839_v5 = vpack.c.bf16 %v646_v3, %v645_v2  ;;  %1752 = vmatpush3.bf16.xpose.msra.mxu0 %v248_v6  ;;  %v648_v9 = vld [vmem:[%s3148_s3 + $0x18] sm:$0xff]  ;;  %v649_v11 = vld [vmem:[%s3148_s3 + $0x20] sm:$0xff]  ;;  %v650_v12 = vld [vmem:[%s3148_s3 + $0x28] sm:$0xff]  ;;  %v251_v13 = vsel %vm222_vm0, %v1901_v7, 0 }
   0x4   :  { %1888 = vmatprep.subr.msk.bf16.mxu0 %vm222_vm0, %v1901_v7  ;;  %v1845_v10 = vpack.c.bf16 %v648_v9, %v647_v8  ;;  %v1902_v14 = vld [vmem:[%s3147_s1 + $0x10] sm:$0xff]   ;;  %v1851_v15 = vpack.c.bf16 %v650_v12, %v649_v11  ;;  %v1908_v17 = vld [vmem:[%s3149_s0] sm:$0xff]   ;;  %v652_v19 = vld [vmem:[%s3148_s3 + $0x38] sm:$0xff]  ;;  %v2029_v12 = vmov -1e+30  }
   0x5   :  { %1841 = vmatprep.subr.msk.bf16.mxu1 %vm2079_vm2, %v1839_v5  ;;  %v651_v16 = vld [vmem:[%s3148_s3 + $0x30] sm:$0xff]  ;;  %v629_v18 = vld [vmem:[%s3150_s2] sm:$0xff]  ;;  %v254_v20 = vsel %vm222_vm0, %v1902_v14, 0  ;;  %v1903_v21 = vld [vmem:[%s3147_s1 + $0x18] sm:$0xff]   ;;  %1767 = vmatprep.mubr.msk.bf16.mxu0 %vm222_vm0, %v1908_v17  ;;  %31 = vst.msk [vmem:[#allocation2 + $0x10] sm:$0xff] %vm28_vm3, %v2029_v12 }
   0x6   :  { %1844 = vmatpush3.bf16.xpose.msk.msra.mxu1 %vm2079_vm2, %v1839_v5  ;;  %1815 = vmatprep.mubr.msk.f32.mxu1 %vm661_vm1, %v629_v18  ;;  %v1857_v22 = vpack.c.bf16 %v652_v19, %v651_v16  ;;  %v653_v23 = vld [vmem:[%s3148_s3 + $0x40] sm:$0xff]  ;;  %v654_v24 = vld [vmem:[%s3148_s3 + $0x48] sm:$0xff]  ;;  %v257_v25 = vsel %vm222_vm0, %v1903_v21, 0  ;;  %v95_v29 = vld [vmem:[%s3151_s4 + $0x10] sm:$0xff]  ;;  %29 = vst.msk [vmem:[#allocation2] sm:$0xff] %vm28_vm3, %v2029_v12 }
   0x7   :  { %1847 = vmatprep.subr.msk.bf16.mxu1 %vm2079_vm2, %v1845_v10  ;;  %v1904_v26 = vld [vmem:[%s3147_s1 + $0x20] sm:$0xff]   ;;  %v94_v27 = vld [vmem:[%s3151_s4 + $0x8] sm:$0xff]  ;;  %v1863_v28 = vpack.c.bf16 %v654_v24, %v653_v23  ;;  %v655_v31 = vld [vmem:[%s3148_s3 + $0x50] sm:$0xff]  ;;  %30 = vst.msk [vmem:[#allocation2 + $0x8] sm:$0xff] %vm28_vm3, %v2029_v12 }
   0x8   :  { %518 = vperm.xlu1 %1899, %v94_v27   ;;  %v93_v30 = vld [vmem:[%s3151_s4] sm:$0xff]  ;;  %v656_v32 = vld [vmem:[%s3148_s3 + $0x58] sm:$0xff]  ;;  %v260_v34 = vsel %vm222_vm0, %v1904_v26, 0  ;;  %v1905_v35 = vld [vmem:[%s3147_s1 + $0x28] sm:$0xff]   ;;  %32 = vst.msk [vmem:[#allocation2 + $0x18] sm:$0xff] %vm28_vm3, %v2029_v12 }
   0x9   :  { %513 = vperm.xlu0 %1898, %v93_v30   ;;  %v96_v33 = vld [vmem:[%s3151_s4 + $0x18] sm:$0xff]  ;;  %v1869_v36 = vpack.c.bf16 %v656_v32, %v655_v31  ;;  %v97_v37 = vld [vmem:[%s3151_s4 + $0x20] sm:$0xff]  ;;  %v658_v39 = vld [vmem:[%s3148_s3 + $0x68] sm:$0xff]  ;;  %v263_v41 = vsel %vm222_vm0, %v1905_v35, 0  ;;  %33 = vst.msk [vmem:[#allocation2 + $0x20] sm:$0xff] %vm28_vm3, %v2029_v12 }
   0xa   :  { %v657_v38 = vld [vmem:[%s3148_s3 + $0x60] sm:$0xff]  ;;  %v98_v40 = vld [vmem:[%s3151_s4 + $0x28] sm:$0xff]  ;;  %v1906_v42 = vld [vmem:[%s3147_s1 + $0x30] sm:$0xff]   ;;  %34 = vst.msk [vmem:[#allocation2 + $0x28] sm:$0xff] %vm28_vm3, %v2029_v12 }
   0xb   :  { %1754 = vmatpush3.bf16.xpose.msra.mxu0 %v251_v13  ;;  %v1875_v43 = vpack.c.bf16 %v658_v39, %v657_v38  ;;  %v99_v44 = vld [vmem:[%s3151_s4 + $0x30] sm:$0xff]  ;;  %v660_v46 = vld [vmem:[%s3148_s3 + $0x78] sm:$0xff]  ;;  %v266_v48 = vsel %vm222_vm0, %v1906_v42, 0  ;;  %v101_v51 = vld [vmem:[%s3151_s4 + $0x40] sm:$0xff]  ;;  %35 = vst.msk [vmem:[#allocation2 + $0x30] sm:$0xff] %vm28_vm3, %v2029_v12 }
   0xc   :  { %1889 = vmatprep.subr.msk.bf16.mxu0 %vm222_vm0, %v1902_v14  ;;  %523 = vperm.xlu1 %1899, %v95_v29   ;;  %v659_v45 = vld [vmem:[%s3148_s3 + $0x70] sm:$0xff]  ;;  %v100_v47 = vld [vmem:[%s3151_s4 + $0x38] sm:$0xff]  ;;  %v1909_v53 = vld [vmem:[%s3149_s0 + $0x8] sm:$0xff]   ;;  %36 = vst.msk [vmem:[#allocation2 + $0x38] sm:$0xff] %vm28_vm3, %v2029_v12 }
   0xd   :  { %v1907_v49 = vld [vmem:[%s3147_s1 + $0x38] sm:$0xff]   ;;  %v1881_v50 = vpack.c.bf16 %v660_v46, %v659_v45  ;;  %v1910_v54 = vld [vmem:[%s3149_s0 + $0x10] sm:$0xff]   ;;  %v630_v55 = vld [vmem:[%s3150_s2 + $0x8] sm:$0xff]  ;;  %37 = vst.msk [vmem:[#allocation2 + $0x40] sm:$0xff] %vm28_vm3, %v2029_v12 }
   0xe   :  { %1850 = vmatpush3.bf16.xpose.msk.msra.mxu1 %vm2079_vm2, %v1845_v10  ;;  %v269_v52 = vsel %vm222_vm0, %v1907_v49, 0  ;;  %v631_v56 = vld [vmem:[%s3150_s2 + $0x10] sm:$0xff]  ;;  %v632_v57 = vld [vmem:[%s3150_s2 + $0x18] sm:$0xff]  ;;  %v633_v58 = vld [vmem:[%s3150_s2 + $0x20] sm:$0xff]  ;;  %38 = vst.msk [vmem:[#allocation2 + $0x48] sm:$0xff] %vm28_vm3, %v2029_v12 }
   0xf   :  { %1853 = vmatprep.subr.msk.bf16.mxu1 %vm2079_vm2, %v1851_v15  ;;  %v1911_v59 = vld [vmem:[%s3149_s0 + $0x18] sm:$0xff]   ;;  %v1912_v60 = vld [vmem:[%s3149_s0 + $0x20] sm:$0xff]   ;;  %v634_v61 = vld [vmem:[%s3150_s2 + $0x28] sm:$0xff]  ;;  %39 = vst.msk [vmem:[#allocation2 + $0x50] sm:$0xff] %vm28_vm3, %v2029_v12 }
  0x10   :  { %528 = vperm.xlu1 %1899, %v96_v33   ;;  %v635_v62 = vld [vmem:[%s3150_s2 + $0x30] sm:$0xff]  ;;  %v636_v63 = vld [vmem:[%s3150_s2 + $0x38] sm:$0xff]  ;;  %v637_v0 = vld [vmem:[%s3150_s2 + $0x40] sm:$0xff]  ;;  %40 = vst.msk [vmem:[#allocation2 + $0x58] sm:$0xff] %vm28_vm3, %v2029_v12 }
  0x11   :  { %v1913_v2 = vld [vmem:[%s3149_s0 + $0x28] sm:$0xff]   ;;  %v1914_v3 = vld [vmem:[%s3149_s0 + $0x30] sm:$0xff]   ;;  %v640_v6 = vld [vmem:[%s3150_s2 + $0x58] sm:$0xff]  ;;  %41 = vst.msk [vmem:[#allocation2 + $0x60] sm:$0xff] %vm28_vm3, %v2029_v12 }
  0x12   :  { %v638_v4 = vld [vmem:[%s3150_s2 + $0x48] sm:$0xff]  ;;  %v639_v5 = vld [vmem:[%s3150_s2 + $0x50] sm:$0xff]  ;;  %v1915_v7 = vld [vmem:[%s3149_s0 + $0x38] sm:$0xff]   ;;  %42 = vst.msk [vmem:[#allocation2 + $0x68] sm:$0xff] %vm28_vm3, %v2029_v12 }
  0x13   :  { %1756 = vmatpush3.bf16.xpose.msra.mxu0 %v254_v20  ;;  %v641_v8 = vld [vmem:[%s3150_s2 + $0x60] sm:$0xff]  ;;  %v642_v9 = vld [vmem:[%s3150_s2 + $0x68] sm:$0xff]  ;;  %v643_v10 = vld [vmem:[%s3150_s2 + $0x70] sm:$0xff]  ;;  %43 = vst.msk [vmem:[#allocation2 + $0x70] sm:$0xff] %vm28_vm3, %v2029_v12 }
  0x14   :  { %1890 = vmatprep.subr.msk.bf16.mxu0 %vm222_vm0, %v1903_v21  ;;  %533 = vperm.xlu1 %1899, %v97_v37   ;;  %v644_v11 = vld [vmem:[%s3150_s2 + $0x78] sm:$0xff]  ;;  %44 = vst.msk [vmem:[#allocation2 + $0x78] sm:$0xff] %vm28_vm3, %v2029_v12  ;;  %v109_v17 = vld [vmem:[%s3152_s5] sm:$0x1] }
  0x15   :  { %vm368_vm4 = vcmp.gt.f32.partialorder %v109_v17, 0.0 }
  0x16   :  { %1856 = vmatpush3.bf16.xpose.msk.msra.mxu1 %vm2079_vm2, %v1851_v15  ;;  %v370_v15 = vlaneseq  ;;  %v369_v21 = vsel %vm368_vm4, 1, %v2028_v1 }
  0x17   :  { %1859 = vmatprep.subr.msk.bf16.mxu1 %vm2079_vm2, %v1857_v22 }
  0x18   :  { %538 = vperm.xlu1 %1899, %v98_v40   ;;  %v2336_v18 = vshrl.u32 %v370_v15, 7 }
  0x1a   :  { %v372_v20 = vsub.s32 0, %v2336_v18  ;;  %v458_v27 = vadd.s32 8, %v2336_v18  ;;  %v461_v29 = vadd.s32 32, %v2336_v18  ;;  %v459_v31 = vadd.s32 16, %v2336_v18 }
  0x1b   :  { %1758 = vmatpush3.bf16.xpose.msra.mxu0 %v257_v25  ;;  %v462_v32 = vadd.s32 40, %v2336_v18 }
  0x1c   :  { %1891 = vmatprep.subr.msk.bf16.mxu0 %vm222_vm0, %v1904_v26  ;;  %543 = vperm.xlu1 %1899, %v99_v44   ;;  %v2342_v23 = vrot.slane %v109_v17, %v372_v20  ;;  %v2344_v26 = vand.u32 127, %v370_v15 }
  0x1e   :  { %1862 = vmatpush3.bf16.xpose.msk.msra.mxu1 %vm2079_vm2, %v1857_v22  ;;  %v2340_v22 = vrot.slane %v369_v21, %v372_v20  ;;  %vm495_vm6 = vcmp.ne.s32.totalorder %v2336_v18, %v2344_v26  ;;  %vm496_vm7 = vcmp.ne.s32.totalorder %v458_v27, %v2344_v26  ;;  %vm499_vm9 = vcmp.ne.s32.totalorder %v461_v29, %v2344_v26 }
  0x1f   :  { %1865 = vmatprep.subr.msk.bf16.mxu1 %vm2079_vm2, %v1863_v28  ;;  %vm497_vm10 = vcmp.ne.s32.totalorder %v459_v31, %v2344_v26  ;;  %vm500_vm13 = vcmp.ne.s32.totalorder %v462_v32, %v2344_v26 }
  0x20   :  { %548 = vperm.xlu1 %1899, %v100_v47   ;;  %vm374_vm5 = vcmp.eq.s32.totalorder %v2340_v22, 1 }
  0x23   :  { %1760 = vmatpush3.bf16.xpose.msra.mxu0 %v260_v34 }
  0x24   :  { %1892 = vmatprep.subr.msk.bf16.mxu0 %vm222_vm0, %v1905_v35  ;;  %553 = vperm.xlu1 %1899, %v101_v51   ;;  %v2362_v35 = vadd.s32 48, %v2336_v18 }
  0x26   :  { %1868 = vmatpush3.bf16.xpose.msk.msra.mxu1 %vm2079_vm2, %v1863_v28  ;;  %v460_v28 = vadd.s32 24, %v2336_v18  ;;  %vm501_vm14 = vcmp.ne.s32.totalorder %v2362_v35, %v2344_v26 }
  0x27   :  { %1871 = vmatprep.subr.msk.bf16.mxu1 %vm2079_vm2, %v1869_v36 }
  0x28   :  { %vm498_vm8 = vcmp.ne.s32.totalorder %v460_v28, %v2344_v26  ;;  %v2030_v28 = vmov 0.0  }
  0x29   :  { %78 = vst.msk [vmem:[#allocation5 + $0x8] sm:$0xff] %vm28_vm3, %v2030_v28  ;;  %45 = vst.msk [vmem:[#allocation3] sm:$0xff] %vm28_vm3, %v2030_v28 }
  0x2a   :  { %46 = vst.msk [vmem:[#allocation3 + $0x8] sm:$0xff] %vm28_vm3, %v2030_v28  ;;  %47 = vst.msk [vmem:[#allocation3 + $0x10] sm:$0xff] %vm28_vm3, %v2030_v28 }
  0x2b   :  { %1762 = vmatpush3.bf16.xpose.msra.mxu0 %v263_v41  ;;  %48 = vst.msk [vmem:[#allocation3 + $0x18] sm:$0xff] %vm28_vm3, %v2030_v28  ;;  %49 = vst.msk [vmem:[#allocation3 + $0x20] sm:$0xff] %vm28_vm3, %v2030_v28 }
  0x2c   :  { %1893 = vmatprep.subr.msk.bf16.mxu0 %vm222_vm0, %v1906_v42  ;;  %50 = vst.msk [vmem:[#allocation3 + $0x28] sm:$0xff] %vm28_vm3, %v2030_v28  ;;  %51 = vst.msk [vmem:[#allocation3 + $0x30] sm:$0xff] %vm28_vm3, %v2030_v28 }
  0x2d   :  { %52 = vst.msk [vmem:[#allocation3 + $0x38] sm:$0xff] %vm28_vm3, %v2030_v28  ;;  %53 = vst.msk [vmem:[#allocation3 + $0x40] sm:$0xff] %vm28_vm3, %v2030_v28 }
  0x2e   :  { %1874 = vmatpush3.bf16.xpose.msk.msra.mxu1 %vm2079_vm2, %v1869_v36  ;;  %v2365_v36 = vadd.s32 56, %v2336_v18  ;;  %54 = vst.msk [vmem:[#allocation3 + $0x48] sm:$0xff] %vm28_vm3, %v2030_v28  ;;  %55 = vst.msk [vmem:[#allocation3 + $0x50] sm:$0xff] %vm28_vm3, %v2030_v28 }
  0x2f   :  { %1877 = vmatprep.subr.msk.bf16.mxu1 %vm2079_vm2, %v1875_v43  ;;  %56 = vst.msk [vmem:[#allocation3 + $0x58] sm:$0xff] %vm28_vm3, %v2030_v28  ;;  %57 = vst.msk [vmem:[#allocation3 + $0x60] sm:$0xff] %vm28_vm3, %v2030_v28 }
  0x30   :  { %vm502_vm15 = vcmp.ne.s32.totalorder %v2365_v36, %v2344_v26  ;;  %58 = vst.msk [vmem:[#allocation3 + $0x68] sm:$0xff] %vm28_vm3, %v2030_v28  ;;  %59 = vst.msk [vmem:[#allocation3 + $0x70] sm:$0xff] %vm28_vm3, %v2030_v28 }
  0x31   :  { %60 = vst.msk [vmem:[#allocation3 + $0x78] sm:$0xff] %vm28_vm3, %v2030_v28  ;;  %61 = vst.msk [vmem:[#allocation4] sm:$0xff] %vm28_vm3, %v2030_v28 }
  0x32   :  { %62 = vst.msk [vmem:[#allocation4 + $0x8] sm:$0xff] %vm28_vm3, %v2030_v28  ;;  %63 = vst.msk [vmem:[#allocation4 + $0x10] sm:$0xff] %vm28_vm3, %v2030_v28 }
  0x33   :  { %1764 = vmatpush3.bf16.xpose.msra.mxu0 %v266_v48  ;;  %64 = vst.msk [vmem:[#allocation4 + $0x18] sm:$0xff] %vm28_vm3, %v2030_v28  ;;  %65 = vst.msk [vmem:[#allocation4 + $0x20] sm:$0xff] %vm28_vm3, %v2030_v28 }
  0x34   :  { %1894 = vmatprep.subr.msk.bf16.mxu0 %vm222_vm0, %v1907_v49  ;;  %66 = vst.msk [vmem:[#allocation4 + $0x28] sm:$0xff] %vm28_vm3, %v2030_v28  ;;  %67 = vst.msk [vmem:[#allocation4 + $0x30] sm:$0xff] %vm28_vm3, %v2030_v28 }
  0x35   :  { %68 = vst.msk [vmem:[#allocation4 + $0x38] sm:$0xff] %vm28_vm3, %v2030_v28  ;;  %69 = vst.msk [vmem:[#allocation4 + $0x40] sm:$0xff] %vm28_vm3, %v2030_v28 }
  0x36   :  { %1880 = vmatpush3.bf16.xpose.msk.msra.mxu1 %vm2079_vm2, %v1875_v43  ;;  %70 = vst.msk [vmem:[#allocation4 + $0x48] sm:$0xff] %vm28_vm3, %v2030_v28  ;;  %71 = vst.msk [vmem:[#allocation4 + $0x50] sm:$0xff] %vm28_vm3, %v2030_v28 }
  0x37   :  { %1883 = vmatprep.subr.msk.bf16.mxu1 %vm2079_vm2, %v1881_v50  ;;  %72 = vst.msk [vmem:[#allocation4 + $0x58] sm:$0xff] %vm28_vm3, %v2030_v28  ;;  %73 = vst.msk [vmem:[#allocation4 + $0x60] sm:$0xff] %vm28_vm3, %v2030_v28 }
  0x38   :  { %74 = vst.msk [vmem:[#allocation4 + $0x68] sm:$0xff] %vm28_vm3, %v2030_v28  ;;  %75 = vst.msk [vmem:[#allocation4 + $0x70] sm:$0xff] %vm28_vm3, %v2030_v28 }
  0x39   :  { %76 = vst.msk [vmem:[#allocation4 + $0x78] sm:$0xff] %vm28_vm3, %v2030_v28  ;;  %77 = vst.msk [vmem:[#allocation5] sm:$0xff] %vm28_vm3, %v2030_v28 }
  0x3a   :  { %79 = vst.msk [vmem:[#allocation5 + $0x10] sm:$0xff] %vm28_vm3, %v2030_v28  ;;  %80 = vst.msk [vmem:[#allocation5 + $0x18] sm:$0xff] %vm28_vm3, %v2030_v28 }
  0x3b   :  { %1766 = vmatpush3.bf16.xpose.msra.mxu0 %v269_v52  ;;  %81 = vst.msk [vmem:[#allocation5 + $0x20] sm:$0xff] %vm28_vm3, %v2030_v28  ;;  %82 = vst.msk [vmem:[#allocation5 + $0x28] sm:$0xff] %vm28_vm3, %v2030_v28 }
  0x3c   :  { %83 = vst.msk [vmem:[#allocation5 + $0x30] sm:$0xff] %vm28_vm3, %v2030_v28  ;;  %84 = vst.msk [vmem:[#allocation5 + $0x38] sm:$0xff] %vm28_vm3, %v2030_v28 }
  0x3d   :  { %85 = vst.msk [vmem:[#allocation5 + $0x40] sm:$0xff] %vm28_vm3, %v2030_v28  ;;  %86 = vst.msk [vmem:[#allocation5 + $0x48] sm:$0xff] %vm28_vm3, %v2030_v28 }
  0x3e   :  { %1886 = vmatpush3.bf16.xpose.msk.msra.mxu1 %vm2079_vm2, %v1881_v50  ;;  %87 = vst.msk [vmem:[#allocation5 + $0x50] sm:$0xff] %vm28_vm3, %v2030_v28  ;;  %88 = vst.msk [vmem:[#allocation5 + $0x58] sm:$0xff] %vm28_vm3, %v2030_v28 }
  0x3f   :  { %89 = vst.msk [vmem:[#allocation5 + $0x60] sm:$0xff] %vm28_vm3, %v2030_v28  ;;  %90 = vst.msk [vmem:[#allocation5 + $0x68] sm:$0xff] %vm28_vm3, %v2030_v28 }
  0x40   :  { %91 = vst.msk [vmem:[#allocation5 + $0x70] sm:$0xff] %vm28_vm3, %v2030_v28  ;;  %92 = vst.msk [vmem:[#allocation5 + $0x78] sm:$0xff] %vm28_vm3, %v2030_v28 }
  0x42   :  { %1768 = vmatmul.mubr.msk.bf16.vlgmr.msra.gmra.mrb[0].mxu0 %vm222_vm0, %v1909_v53 }
  0x43   :  { %1771 = vmatprep.mubr.msk.bf16.mxu0 %vm222_vm0, %v1910_v54 }
  0x45   :  { %1816 = vmatmul.mubr.msk.f32.vlgmr.msra.gmra.mrb[0].mxu1 %vm661_vm1, %v630_v55 }
  0x46   :  { %1818 = vmatprep.mubr.msk.f32.mxu1 %vm661_vm1, %v631_v56 }
  0x49   :  { %1819 = vmatmul.mubr.msk.f32.gmra.mrb[2].mxu1 %vm661_vm1, %v632_v57 }
  0x4a   :  { %1821 = vmatprep.mubr.msk.f32.mxu1 %vm661_vm1, %v633_v58  ;;  %1772 = vmatmul.mubr.msk.bf16.gmra.mrb[4].mxu0 %vm222_vm0, %v1911_v59 }
  0x4b   :  { %1775 = vmatprep.mubr.msk.bf16.mxu0 %vm222_vm0, %v1912_v60 }
  0x4d   :  { %1822 = vmatmul.mubr.msk.f32.gmra.mrb[4].mxu1 %vm661_vm1, %v634_v61 }
  0x4e   :  { %1824 = vmatprep.mubr.msk.f32.mxu1 %vm661_vm1, %v635_v62 }
  0x51   :  { %1825 = vmatmul.mubr.msk.f32.gmra.mrb[6].mxu1 %vm661_vm1, %v636_v63 }
  0x52   :  { %1827 = vmatprep.mubr.msk.f32.mxu1 %vm661_vm1, %v637_v0  ;;  %1776 = vmatmul.mubr.msk.bf16.gmra.mrb[8].mxu0 %vm222_vm0, %v1913_v2  ;;  %v2416_v2 = vadd.s32 64, %v2336_v18 }
  0x53   :  { %1779 = vmatprep.mubr.msk.bf16.mxu0 %vm222_vm0, %v1914_v3 }
  0x55   :  { %1828 = vmatmul.mubr.msk.f32.gmra.mrb[8].mxu1 %vm661_vm1, %v638_v4 }
  0x56   :  { %1830 = vmatprep.mubr.msk.f32.mxu1 %vm661_vm1, %v639_v5 }
  0x59   :  { %1831 = vmatmul.mubr.msk.f32.gmra.mrb[10].mxu1 %vm661_vm1, %v640_v6 }
  0x5a   :  { %1833 = vmatprep.mubr.msk.f32.mxu1 %vm661_vm1, %v641_v8  ;;  %1780 = vmatmul.mubr.msk.bf16.gmra.mrb[12].mxu0 %vm222_vm0, %v1915_v7 }
  0x5d   :  { %1834 = vmatmul.mubr.msk.f32.gmra.mrb[12].mxu1 %vm661_vm1, %v642_v9 }
  0x5e   :  { %1836 = vmatprep.mubr.msk.f32.mxu1 %vm661_vm1, %v643_v10 }
  0x61   :  { %1837 = vmatmul.mubr.msk.f32.gmra.mrb[14].mxu1 %vm661_vm1, %v644_v11 }
  0x87   :  { %v519_v13 = vpop.permute.xlu1 %518 }
  0x88   :  { %v514_v25 = vpop.permute.xlu0 %513  ;;  %v598_v1 = vmul.f32 %v2342_v23, %v519_v13 }
  0x89   :  { %v597_v30 = vmul.f32 %v2342_v23, %v514_v25 }
  0x8a   :  { %v614_v41 = vsel %vm496_vm7, %v598_v1, 0.0  ;;  %vm503_vm7 = vcmp.ne.s32.totalorder %v2416_v2, %v2344_v26 }
  0x8b   :  { %v524_v14 = vpop.permute.xlu1 %523  ;;  %v613_v37 = vsel %vm495_vm6, %v597_v30, 0.0 }
  0x8c   :  { %v599_v45 = vmul.f32 %v2342_v23, %v524_v14 }
  0x8e   :  { %v615_v62 = vsel %vm497_vm10, %v599_v45, 0.0 }
  0x8f   :  { %v529_v16 = vpop.permute.xlu1 %528 }
  0x90   :  { %v600_v40 = vmul.f32 %v2342_v23, %v529_v16 }
  0x92   :  { %v616_v56 = vsel %vm498_vm8, %v600_v40, 0.0 }
  0x93   :  { %v534_v19 = vpop.permute.xlu1 %533 }
  0x94   :  { %v601_v50 = vmul.f32 %v2342_v23, %v534_v19 }
  0x96   :  { %v2413_v0 = vsel %vm499_vm9, %v601_v50, 0.0 }
  0x97   :  { %v539_v24 = vpop.permute.xlu1 %538 }
  0x98   :  { %v602_v53 = vmul.f32 %v2342_v23, %v539_v24 }
  0x9a   :  { %v2424_v5 = vsel %vm500_vm13, %v602_v53, 0.0 }
  0x9b   :  { %v544_v33 = vpop.permute.xlu1 %543 }
  0x9c   :  { %v2460_v16 = vmul.f32 %v2342_v23, %v544_v33 }
  0x9f   :  { %v549_v57 = vpop.permute.xlu1 %548 }
  0xa0   :  { %v2441_v10 = vmul.f32 %v2342_v23, %v549_v57 }
  0xa2   :  { %v620_v1 = vsel %vm502_vm15, %v2441_v10, 0.0 }
  0xa3   :  { %v554_v24 = vpop.permute.xlu1 %553 }
  0xa4   :  { %v605_v36 = vmul.f32 %v2342_v23, %v554_v24 }
 0x115   :  { %v2359_v34 = vpop.f32.mrb[0].mxu0 }
 0x116   :  { %v2367_v38 = vpop.f32.mrb[1].mxu0  ;;  %v377_v39 = vsel %vm374_vm5, %v2359_v34, -1e+30 }
 0x117   :  { %395 = vmax.xlane.f32.xlu1 %v377_v39  ;;  %v2373_v43 = vpop.f32.mrb[2].mxu0  ;;  %v375_v44 = vsel %vm374_vm5, %v2367_v38, -1e+30 }
 0x118   :  { %v1817_v42 = vpop.f32.mrb[0].mxu1  ;;  %391 = vmax.xlane.f32.xlu0 %v375_v44  ;;  %v2380_v48 = vpop.f32.mrb[3].mxu0  ;;  %v378_v49 = vsel %vm374_vm5, %v2373_v43, -1e+30 }
 0x119   :  { %v904_v46 = vmul.f32 %v1817_v42, %v614_v41  ;;  %vm920_vm11 = vcmp.eq.f32.partialorder %v1817_v42, 0.0  ;;  %v824_v47 = vpop.f32.mrb[1].mxu1  ;;  %v376_v52 = vsel %vm374_vm5, %v2380_v48, -1e+30 }
 0x11a   :  { %v903_v51 = vmul.f32 %v824_v47, %v613_v37  ;;  %vm919_vm12 = vcmp.eq.f32.partialorder %v824_v47, 0.0 }
 0x11b   :  { %v2392_v54 = vmul.f32 %v904_v46, %v2380_v48  ;;  %v2394_v55 = vsel %vm920_vm11, %v614_v41, %v904_v46  ;;  %1370 = vadd.xlane.f32.xlu1 %v904_v46 }
 0x11c   :  { %v1820_v58 = vpop.f32.mrb[2].mxu1  ;;  %v2401_v59 = vmul.f32 %v903_v51, %v2367_v38  ;;  %v2403_v60 = vsel %vm919_vm12, %v613_v37, %v903_v51  ;;  %1368 = vadd.xlane.f32.xlu0 %v903_v51  ;;  %v619_v37 = vsel %vm501_vm14, %v2460_v16, 0.0  ;;  %v105_v16 = vld [vmem:[%s3151_s4 + $0x60] sm:$0xff] }
 0x11d   :  { %v2407_v61 = vmul.f32 %v1820_v58, %v616_v56  ;;  %vm922_vm0 = vcmp.eq.f32.partialorder %v1820_v58, 0.0  ;;  %v834_v63 = vpop.f32.mrb[3].mxu1  ;;  %v2420_v4 = vpop.f32.mrb[4].mxu0 }
 0x11e   :  { %v2418_v3 = vmul.f32 %v834_v63, %v615_v62  ;;  %vm921_vm1 = vcmp.eq.f32.partialorder %v834_v63, 0.0  ;;  %v2426_v6 = vpop.f32.mrb[5].mxu0  ;;  %v2431_v7 = vsel %vm374_vm5, %v2420_v4, -1e+30 }
 0x11f   :  { %v2435_v8 = vmul.f32 %v2373_v43, %v2407_v61  ;;  %v2438_v9 = vsel %vm922_vm0, %v616_v56, %v2407_v61  ;;  %397 = vmax.xlane.f32.xlu1 %v378_v49  ;;  %v2445_v12 = vpop.f32.mrb[6].mxu0  ;;  %v2450_v13 = vsel %vm374_vm5, %v2426_v6, -1e+30 }
 0x120   :  { %v2443_v11 = vpop.f32.mrb[4].mxu1  ;;  %v2454_v14 = vmul.f32 %v2359_v34, %v2418_v3  ;;  %v2457_v15 = vsel %vm921_vm1, %v615_v62, %v2418_v3  ;;  %393 = vmax.xlane.f32.xlu0 %v376_v52  ;;  %v2469_v20 = vpop.f32.mrb[7].mxu0  ;;  %v2474_v21 = vsel %vm374_vm5, %v2445_v12, -1e+30  ;;  %v621_v52 = vsel %vm503_vm7, %v605_v36, 0.0  ;;  %v2663_v36 = vld [vmem:[#allocation2 + $0x10] sm:$0xff] }
 0x121   :  { %v2464_v17 = vmul.f32 %v2443_v11, %v2424_v5  ;;  %vm924_vm2 = vcmp.eq.f32.partialorder %v2443_v11, 0.0  ;;  %v2467_v19 = vpop.f32.mrb[5].mxu1  ;;  %v2484_v27 = vsel %vm374_vm5, %v2469_v20, -1e+30  ;;  %3186 = vst [vmem:[#allocation6_spill] sm:$0xff] %v2663_v36 }
 0x122   :  { %v2478_v25 = vmul.f32 %v2467_v19, %v2413_v0  ;;  %vm923_vm4 = vcmp.eq.f32.partialorder %v2467_v19, 0.0  ;;  %v107_v19 = vld [vmem:[%s3151_s4 + $0x70] sm:$0xff] }
 0x123   :  { %v2536_v29 = vmul.f32 %v2464_v17, %v2469_v20  ;;  %v2542_v30 = vsel %vm924_vm2, %v2424_v5, %v2464_v17  ;;  %1374 = vadd.xlane.f32.xlu1 %v2407_v61 }
 0x124   :  { %v1826_v31 = vpop.f32.mrb[6].mxu1  ;;  %v2551_v32 = vmul.f32 %v2478_v25, %v2426_v6  ;;  %v2557_v33 = vsel %vm923_vm4, %v2413_v0, %v2478_v25  ;;  %1372 = vadd.xlane.f32.xlu0 %v2418_v3 }
 0x125   :  { %v2564_v39 = vmul.f32 %v1826_v31, %v620_v1  ;;  %vm926_vm6 = vcmp.eq.f32.partialorder %v1826_v31, 0.0  ;;  %v854_v40 = vpop.f32.mrb[7].mxu1  ;;  %v2569_v42 = vpop.f32.mrb[8].mxu0  ;;  %v106_v31 = vld [vmem:[%s3151_s4 + $0x68] sm:$0xff] }
 0x126   :  { %v909_v41 = vmul.f32 %v854_v40, %v619_v37  ;;  %vm925_vm8 = vcmp.eq.f32.partialorder %v854_v40, 0.0  ;;  %v2571_v44 = vpop.f32.mrb[9].mxu0  ;;  %v385_v35 = vsel %vm374_vm5, %v2569_v42, -1e+30  ;;  %v2665_v40 = vld [vmem:[#allocation2] sm:$0xff] }
 0x127   :  { %v2577_v45 = vsel %vm926_vm6, %v620_v1, %v2564_v39  ;;  %1378 = vadd.xlane.f32.xlu1 %v2464_v17  ;;  %v2582_v47 = vpop.f32.mrb[10].mxu0  ;;  %v383_v49 = vsel %vm374_vm5, %v2571_v44, -1e+30  ;;  %3187 = vst [vmem:[#allocation7_spill] sm:$0xff] %v2665_v40 }
 0x128   :  { %v2579_v46 = vpop.f32.mrb[8].mxu1  ;;  %v2588_v50 = vmul.f32 %v2420_v4, %v909_v41  ;;  %v2590_v51 = vsel %vm925_vm8, %v619_v37, %v909_v41  ;;  %403 = vmax.xlane.f32.xlu0 %v2431_v7  ;;  %v2593_v56 = vpop.f32.mrb[11].mxu0  ;;  %v386_v57 = vsel %vm374_vm5, %v2582_v47, -1e+30  ;;  %v108_v37 = vld [vmem:[%s3151_s4 + $0x78] sm:$0xff] }
 0x129   :  { %v864_v53 = vpop.f32.mrb[9].mxu1  ;;  %v384_v61 = vsel %vm374_vm5, %v2593_v56, -1e+30  ;;  %vm928_vm0 = vcmp.eq.f32.partialorder %v2579_v46, 0.0 }
 0x12a   :  { %v2598_v58 = vmul.f32 %v864_v53, %v621_v52  ;;  %vm927_vm9 = vcmp.eq.f32.partialorder %v864_v53, 0.0  ;;  %v1353_v53 = vld [vmem:[#allocation5 + $0x8] sm:$0xff] }
 0x12b   :  { %405 = vmax.xlane.f32.xlu1 %v2474_v21  ;;  %v102_v21 = vld [vmem:[%s3151_s4 + $0x48] sm:$0xff] }
 0x12c   :  { %v2605_v62 = vsel %vm927_vm9, %v621_v52, %v2598_v58  ;;  %399 = vmax.xlane.f32.xlu0 %v2450_v13  ;;  %v103_v13 = vld [vmem:[%s3151_s4 + $0x50] sm:$0xff]  ;;  %v2636_v22 = vpop.f32.mrb[10].mxu1 }
 0x12d   :  { %v2608_v63 = vpop.f32.mrb[12].mxu0  ;;  %v2638_v17 = vpop.f32.mrb[11].mxu1  ;;  %vm930_vm2 = vcmp.eq.f32.partialorder %v2636_v22, 0.0 }
 0x12e   :  { %v2610_v0 = vpop.f32.mrb[13].mxu0  ;;  %v389_v2 = vsel %vm374_vm5, %v2608_v63, -1e+30  ;;  %vm929_vm10 = vcmp.eq.f32.partialorder %v2638_v17, 0.0 }
 0x12f   :  { %401 = vmax.xlane.f32.xlu1 %v2484_v27  ;;  %v2616_v3 = vpop.f32.mrb[14].mxu0  ;;  %v387_v5 = vsel %vm374_vm5, %v2610_v0, -1e+30  ;;  %v104_v27 = vld [vmem:[%s3151_s4 + $0x58] sm:$0xff] }
 0x130   :  { %1376 = vadd.xlane.f32.xlu0 %v2478_v25  ;;  %v390_v7 = vsel %vm374_vm5, %v2616_v3, -1e+30  ;;  %v2625_v10 = vpop.f32.mrb[15].mxu0  ;;  %v2646_v24 = vpop.f32.mrb[12].mxu1 }
 0x131   :  { %v388_v11 = vsel %vm374_vm5, %v2625_v10, -1e+30  ;;  %v2648_v25 = vpop.f32.mrb[13].mxu1  ;;  %vm932_vm6 = vcmp.eq.f32.partialorder %v2646_v24, 0.0 }
 0x132   :  { %vm931_vm12 = vcmp.eq.f32.partialorder %v2648_v25, 0.0 }
 0x133   :  { %413 = vmax.xlane.f32.xlu1 %v386_v57 }
 0x134   :  { %411 = vmax.xlane.f32.xlu0 %v385_v35  ;;  %v2653_v28 = vpop.f32.mrb[14].mxu1 }
 0x135   :  { %v2655_v1 = vpop.f32.mrb[15].mxu1  ;;  %vm934_vm8 = vcmp.eq.f32.partialorder %v2653_v28, 0.0 }
 0x136   :  { %vm933_vm15 = vcmp.eq.f32.partialorder %v2655_v1, 0.0 }
 0x137   :  { %409 = vmax.xlane.f32.xlu1 %v384_v61  ;;  %v1352_v61 = vld [vmem:[#allocation5] sm:$0xff] }
 0x138   :  { %407 = vmax.xlane.f32.xlu0 %v383_v49 }
 0x13b   :  { %421 = vmax.xlane.f32.xlu1 %v390_v7 }
 0x13c   :  { %419 = vmax.xlane.f32.xlu0 %v389_v2 }
 0x13f   :  { %417 = vmax.xlane.f32.xlu1 %v388_v11 }
 0x140   :  { %415 = vmax.xlane.f32.xlu0 %v387_v5 }
 0x144   :  { %1380 = vadd.xlane.f32.xlu0 %v909_v41 }
 0x150   :  { %563 = vperm.xlu1 %1899, %v103_v13  }
 0x154   :  { %573 = vperm.xlu1 %1899, %v105_v16   ;;  %v2682_v16 = vld [vmem:[#allocation2 + $0x18] sm:$0xff] }
 0x155   :  { %3190 = vst [vmem:[#allocation10_spill] sm:$0xff] %v2682_v16 }
 0x158   :  { %583 = vperm.xlu1 %1899, %v107_v19   ;;  %v2686_v19 = vld [vmem:[#allocation2 + $0x8] sm:$0xff] }
 0x159   :  { %3191 = vst [vmem:[#allocation11_spill] sm:$0xff] %v2686_v19 }
 0x15a   :  { %558 = vperm.xlu0 %1898, %v102_v21  }
 0x15e   :  { %568 = vperm.xlu0 %1898, %v104_v27  }
 0x162   :  { %578 = vperm.xlu0 %1898, %v106_v31  }
 0x166   :  { %588 = vperm.xlu0 %1898, %v108_v37  }
 0x1a4   :  { %v396_v41 = vpop.xlane.xlu1 %395 }
 0x1a5   :  { %v2668_v35 = vmax.f32 %v2663_v36, %v396_v41  ;;  %v392_v49 = vpop.xlane.xlu0 %391  ;;  %v1355_v41 = vld [vmem:[#allocation5 + $0x18] sm:$0xff] }
 0x1a6   :  { %v2671_v52 = vmax.f32 %v2665_v40, %v392_v49 }
 0x1a7   :  { %3188 = vst [vmem:[#allocation8_spill] sm:$0xff] %v2668_v35  ;;  %1434 = vst.msk [vmem:[#allocation2 + $0x10] sm:$0xff] %vm28_vm3, %v2668_v35  ;;  %1011 = vperm.xlu1 %1899, %v2668_v35  }
 0x1a8   :  { %3189 = vst [vmem:[#allocation9_spill] sm:$0xff] %v2671_v52  ;;  %1432 = vst.msk [vmem:[#allocation2] sm:$0xff] %vm28_vm3, %v2671_v52  ;;  %v1371_v5 = vpop.xlane.xlu1 %1370 }
 0x1a9   :  { %v1401_v7 = vadd.f32 %v1371_v5, %v1353_v53  ;;  %v1369_v11 = vpop.xlane.xlu0 %1368  ;;  %v1354_v53 = vld [vmem:[#allocation5 + $0x10] sm:$0xff] }
 0x1aa   :  { %v1400_v13 = vadd.f32 %v1369_v11, %v1352_v61 }
 0x1ab   :  { %1417 = vst.msk [vmem:[#allocation5 + $0x8] sm:$0xff] %vm28_vm3, %v1401_v7  ;;  %1001 = vperm.xlu1 %1899, %v2671_v52  }
 0x1ac   :  { %1416 = vst.msk [vmem:[#allocation5] sm:$0xff] %vm28_vm3, %v1400_v13  ;;  %v398_v21 = vpop.xlane.xlu1 %397 }
 0x1ad   :  { %v2690_v27 = vmax.f32 %v2682_v16, %v398_v21  ;;  %v394_v31 = vpop.xlane.xlu0 %393  ;;  %v1357_v21 = vld [vmem:[#allocation5 + $0x28] sm:$0xff] }
 0x1ae   :  { %v2693_v37 = vmax.f32 %v2686_v19, %v394_v31  ;;  %v2706_v31 = vld [vmem:[#allocation2 + $0x30] sm:$0xff]  ;;  %v2712_v19 = vld [vmem:[#allocation2 + $0x38] sm:$0xff] }
 0x1af   :  { %3192 = vst [vmem:[#allocation12_spill] sm:$0xff] %v2690_v27  ;;  %1435 = vst.msk [vmem:[#allocation2 + $0x18] sm:$0xff] %vm28_vm3, %v2690_v27  ;;  %1016 = vperm.xlu0 %1898, %v2690_v27  }
 0x1b0   :  { %3193 = vst [vmem:[#allocation13_spill] sm:$0xff] %v2693_v37  ;;  %1433 = vst.msk [vmem:[#allocation2 + $0x8] sm:$0xff] %vm28_vm3, %v2693_v37  ;;  %v1375_v5 = vpop.xlane.xlu1 %1374 }
 0x1b1   :  { %v1403_v7 = vadd.f32 %v1375_v5, %v1355_v41  ;;  %v1373_v11 = vpop.xlane.xlu0 %1372  ;;  %3194 = vst [vmem:[#allocation14_spill] sm:$0xff] %v2706_v31  ;;  %3196 = vst [vmem:[#allocation16_spill] sm:$0xff] %v2712_v19  ;;  %v2715_v41 = vld [vmem:[#allocation2 + $0x20] sm:$0xff] }
 0x1b2   :  { %v1402_v13 = vadd.f32 %v1373_v11, %v1354_v53  ;;  %3197 = vst [vmem:[#allocation17_spill] sm:$0xff] %v2715_v41  ;;  %v2728_v11 = vld [vmem:[#allocation2 + $0x28] sm:$0xff] }
 0x1b3   :  { %1419 = vst.msk [vmem:[#allocation5 + $0x18] sm:$0xff] %vm28_vm3, %v1403_v7  ;;  %1006 = vperm.xlu0 %1898, %v2693_v37   ;;  %3200 = vst [vmem:[#allocation20_spill] sm:$0xff] %v2728_v11  ;;  %v466_v37 = vadd.s32 72, %v2336_v18 }
 0x1b4   :  { %1418 = vst.msk [vmem:[#allocation5 + $0x10] sm:$0xff] %vm28_vm3, %v1402_v13  ;;  %v1379_v49 = vpop.xlane.xlu1 %1378  ;;  %v1356_v13 = vld [vmem:[#allocation5 + $0x20] sm:$0xff] }
 0x1b5   :  { %v1405_v2 = vadd.f32 %v1379_v49, %v1357_v21  ;;  %v404_v57 = vpop.xlane.xlu0 %403  ;;  %v2750_v21 = vld [vmem:[#allocation2 + $0x50] sm:$0xff]  ;;  %vm504_vm14 = vcmp.ne.s32.totalorder %v466_v37, %v2344_v26 }
 0x1b6   :  { %v2710_v61 = vmax.f32 %v2706_v31, %v404_v57  ;;  %3203 = vst [vmem:[#allocation23_spill] sm:$0xff] %v2750_v21 }
 0x1b7   :  { %1421 = vst.msk [vmem:[#allocation5 + $0x28] sm:$0xff] %vm28_vm3, %v1405_v2 }
 0x1b8   :  { %3195 = vst [vmem:[#allocation15_spill] sm:$0xff] %v2710_v61  ;;  %1438 = vst.msk [vmem:[#allocation2 + $0x30] sm:$0xff] %vm28_vm3, %v2710_v61  ;;  %v406_v5 = vpop.xlane.xlu1 %405  ;;  %1031 = vperm.xlu1 %1899, %v2710_v61   ;;  %v1358_v61 = vld [vmem:[#allocation5 + $0x30] sm:$0xff] }
 0x1b9   :  { %v2723_v49 = vmax.f32 %v2712_v19, %v406_v5  ;;  %v400_v57 = vpop.xlane.xlu0 %399  ;;  %v2743_v19 = vld [vmem:[#allocation2 + $0x58] sm:$0xff] }
 0x1ba   :  { %v2726_v7 = vmax.f32 %v2715_v41, %v400_v57  ;;  %3202 = vst [vmem:[#allocation22_spill] sm:$0xff] %v2743_v19 }
 0x1bb   :  { %3198 = vst [vmem:[#allocation18_spill] sm:$0xff] %v2723_v49  ;;  %1439 = vst.msk [vmem:[#allocation2 + $0x38] sm:$0xff] %vm28_vm3, %v2723_v49  ;;  %1036 = vperm.xlu0 %1898, %v2723_v49  }
 0x1bc   :  { %3199 = vst [vmem:[#allocation19_spill] sm:$0xff] %v2726_v7  ;;  %1436 = vst.msk [vmem:[#allocation2 + $0x20] sm:$0xff] %vm28_vm3, %v2726_v7  ;;  %v402_v5 = vpop.xlane.xlu1 %401  ;;  %1021 = vperm.xlu1 %1899, %v2726_v7  }
 0x1bd   :  { %v2741_v57 = vmax.f32 %v2728_v11, %v402_v5  ;;  %v1377_v53 = vpop.xlane.xlu0 %1376  ;;  %v2779_v11 = vld [vmem:[#allocation2 + $0x78] sm:$0xff] }
 0x1be   :  { %v1404_v2 = vadd.f32 %v1377_v53, %v1356_v13  ;;  %v2759_v13 = vld [vmem:[#allocation2 + $0x48] sm:$0xff]  ;;  %3210 = vst [vmem:[#allocation30_spill] sm:$0xff] %v2779_v11 }
 0x1bf   :  { %3201 = vst [vmem:[#allocation21_spill] sm:$0xff] %v2741_v57  ;;  %1437 = vst.msk [vmem:[#allocation2 + $0x28] sm:$0xff] %vm28_vm3, %v2741_v57  ;;  %1026 = vperm.xlu0 %1898, %v2741_v57   ;;  %v2766_v57 = vld [vmem:[#allocation2 + $0x40] sm:$0xff] }
 0x1c0   :  { %1420 = vst.msk [vmem:[#allocation5 + $0x20] sm:$0xff] %vm28_vm3, %v1404_v2  ;;  %v414_v7 = vpop.xlane.xlu1 %413  ;;  %3206 = vst [vmem:[#allocation26_spill] sm:$0xff] %v2759_v13 }
 0x1c1   :  { %v2754_v5 = vmax.f32 %v2743_v19, %v414_v7  ;;  %v412_v41 = vpop.xlane.xlu0 %411  ;;  %3207 = vst [vmem:[#allocation27_spill] sm:$0xff] %v2766_v57  ;;  %v2786_v7 = vld [vmem:[#allocation2 + $0x70] sm:$0xff] }
 0x1c2   :  { %v2757_v53 = vmax.f32 %v2750_v21, %v412_v41  ;;  %3211 = vst [vmem:[#allocation31_spill] sm:$0xff] %v2786_v7  ;;  %v2799_v21 = vld [vmem:[#allocation2 + $0x68] sm:$0xff] }
 0x1c3   :  { %3204 = vst [vmem:[#allocation24_spill] sm:$0xff] %v2754_v5  ;;  %1443 = vst.msk [vmem:[#allocation2 + $0x58] sm:$0xff] %vm28_vm3, %v2754_v5  ;;  %1056 = vperm.xlu0 %1898, %v2754_v5  }
 0x1c4   :  { %3205 = vst [vmem:[#allocation25_spill] sm:$0xff] %v2757_v53  ;;  %1442 = vst.msk [vmem:[#allocation2 + $0x50] sm:$0xff] %vm28_vm3, %v2757_v53  ;;  %v410_v41 = vpop.xlane.xlu1 %409  ;;  %1051 = vperm.xlu1 %1899, %v2757_v53  }
 0x1c5   :  { %v2774_v2 = vmax.f32 %v2759_v13, %v410_v41  ;;  %v408_v49 = vpop.xlane.xlu0 %407  ;;  %3213 = vst [vmem:[#allocation33_spill] sm:$0xff] %v2799_v21 }
 0x1c6   :  { %v2777_v19 = vmax.f32 %v2766_v57, %v408_v49 }
 0x1c7   :  { %3208 = vst [vmem:[#allocation28_spill] sm:$0xff] %v2774_v2  ;;  %1441 = vst.msk [vmem:[#allocation2 + $0x48] sm:$0xff] %vm28_vm3, %v2774_v2  ;;  %1046 = vperm.xlu0 %1898, %v2774_v2   ;;  %v2803_v2 = vld [vmem:[#allocation2 + $0x60] sm:$0xff] }
 0x1c8   :  { %3209 = vst [vmem:[#allocation29_spill] sm:$0xff] %v2777_v19  ;;  %1440 = vst.msk [vmem:[#allocation2 + $0x40] sm:$0xff] %vm28_vm3, %v2777_v19  ;;  %v422_v49 = vpop.xlane.xlu1 %421  ;;  %1041 = vperm.xlu1 %1899, %v2777_v19  }
 0x1c9   :  { %v2794_v53 = vmax.f32 %v2779_v11, %v422_v49  ;;  %v420_v5 = vpop.xlane.xlu0 %419  ;;  %3214 = vst [vmem:[#allocation34_spill] sm:$0xff] %v2803_v2  ;;  %v467_v11 = vadd.s32 80, %v2336_v18 }
 0x1ca   :  { %v2797_v13 = vmax.f32 %v2786_v7, %v420_v5 }
 0x1cb   :  { %1447 = vst.msk [vmem:[#allocation2 + $0x78] sm:$0xff] %vm28_vm3, %v2794_v53  ;;  %vm505_vm5 = vcmp.ne.s32.totalorder %v467_v11, %v2344_v26 }
 0x1cc   :  { %3212 = vst [vmem:[#allocation32_spill] sm:$0xff] %v2797_v13  ;;  %1446 = vst.msk [vmem:[#allocation2 + $0x70] sm:$0xff] %vm28_vm3, %v2797_v13  ;;  %1071 = vperm.xlu1 %1899, %v2797_v13   ;;  %v418_v49 = vpop.xlane.xlu1 %417 }
 0x1cd   :  { %v2812_v5 = vmax.f32 %v2799_v21, %v418_v49  ;;  %v416_v19 = vpop.xlane.xlu0 %415  ;;  %v469_v21 = vadd.s32 96, %v2336_v18 }
 0x1ce   :  { %v2815_v57 = vmax.f32 %v2803_v2, %v416_v19 }
 0x1cf   :  { %1445 = vst.msk [vmem:[#allocation2 + $0x68] sm:$0xff] %vm28_vm3, %v2812_v5  ;;  %vm507_vm11 = vcmp.ne.s32.totalorder %v469_v21, %v2344_v26 }
 0x1d0   :  { %3215 = vst [vmem:[#allocation35_spill] sm:$0xff] %v2815_v57  ;;  %1444 = vst.msk [vmem:[#allocation2 + $0x60] sm:$0xff] %vm28_vm3, %v2815_v57  ;;  %1061 = vperm.xlu1 %1899, %v2815_v57   ;;  %v564_v49 = vpop.permute.xlu1 %563  ;;  %v471_v57 = vadd.s32 112, %v2336_v18 }
 0x1d1   :  { %v607_v19 = vmul.f32 %v2342_v23, %v564_v49  ;;  %v1381_v13 = vpop.xlane.xlu0 %1380  ;;  %v468_v49 = vadd.s32 88, %v2336_v18 }
 0x1d2   :  { %v1406_v7 = vadd.f32 %v1381_v13, %v1358_v61  ;;  %vm509_vm13 = vcmp.ne.s32.totalorder %v471_v57, %v2344_v26 }
 0x1d3   :  { %v623_v31 = vsel %vm505_vm5, %v607_v19, 0.0  ;;  %vm506_vm1 = vcmp.ne.s32.totalorder %v468_v49, %v2344_v26 }
 0x1d4   :  { %1422 = vst.msk [vmem:[#allocation5 + $0x30] sm:$0xff] %vm28_vm3, %v1406_v7  ;;  %v913_v41 = vmul.f32 %v2638_v17, %v623_v31  ;;  %v574_v2 = vpop.permute.xlu1 %573 }
 0x1d5   :  { %v609_v11 = vmul.f32 %v2342_v23, %v574_v2 }
 0x1d6   :  { %v2834_v27 = vsel %vm929_vm10, %v623_v31, %v913_v41  ;;  %v2837_v61 = vmul.f32 %v2569_v42, %v913_v41 }
 0x1d7   :  { %v625_v13 = vsel %vm507_vm11, %v609_v11, 0.0 }
 0x1d8   :  { %v915_v7 = vmul.f32 %v2648_v25, %v625_v13  ;;  %v584_v17 = vpop.permute.xlu1 %583 }
 0x1d9   :  { %v611_v21 = vmul.f32 %v2342_v23, %v584_v17  ;;  %v559_v2 = vpop.permute.xlu0 %558 }
 0x1da   :  { %v606_v31 = vmul.f32 %v2342_v23, %v559_v2  ;;  %v2846_v19 = vsel %vm931_vm12, %v625_v13, %v915_v7  ;;  %v2849_v11 = vmul.f32 %v915_v7, %v2610_v0  ;;  %v470_v2 = vadd.s32 104, %v2336_v18 }
 0x1db   :  { %v627_v16 = vsel %vm509_vm13, %v611_v21, 0.0 }
 0x1dc   :  { %v622_v25 = vsel %vm504_vm14, %v606_v31, 0.0  ;;  %v917_v57 = vmul.f32 %v2655_v1, %v627_v16  ;;  %vm508_vm4 = vcmp.ne.s32.totalorder %v470_v2, %v2344_v26 }
 0x1dd   :  { %v912_v37 = vmul.f32 %v2579_v46, %v622_v25  ;;  %v569_v17 = vpop.permute.xlu0 %568 }
 0x1de   :  { %v608_v13 = vmul.f32 %v2342_v23, %v569_v17  ;;  %v2858_v52 = vsel %vm933_vm15, %v627_v16, %v917_v57  ;;  %v2861_v21 = vmul.f32 %v2608_v63, %v917_v57  ;;  %v472_v17 = vadd.s32 120, %v2336_v18 }
 0x1df   :  { %v2863_v40 = vsel %vm928_vm0, %v622_v25, %v912_v37  ;;  %v2866_v31 = vmul.f32 %v912_v37, %v2593_v56 }
 0x1e0   :  { %v624_v46 = vsel %vm506_vm1, %v608_v13, 0.0  ;;  %vm510_vm7 = vcmp.ne.s32.totalorder %v472_v17, %v2344_v26 }
 0x1e1   :  { %3216 = vst [vmem:[#allocation36_spill] sm:$0xff] %v2866_v31  ;;  %v914_v1 = vmul.f32 %v2636_v22, %v624_v46  ;;  %v579_v49 = vpop.permute.xlu0 %578 }
 0x1e2   :  { %v610_v16 = vmul.f32 %v2342_v23, %v579_v49 }
 0x1e3   :  { %v2873_v35 = vsel %vm930_vm2, %v624_v46, %v914_v1  ;;  %v2876_v25 = vmul.f32 %v2582_v47, %v914_v1 }
 0x1e4   :  { %v626_v36 = vsel %vm508_vm4, %v610_v16, 0.0 }
 0x1e5   :  { %v916_v31 = vmul.f32 %v2646_v24, %v626_v36  ;;  %v589_v22 = vpop.permute.xlu0 %588 }
 0x1e6   :  { %v612_v2 = vmul.f32 %v2342_v23, %v589_v22  ;;  %1384 = vadd.xlane.f32.xlu0 %v2598_v58  ;;  %v1279_v23 = vmul.f32 %v2445_v12, %v2564_v39 }
 0x1e7   :  { %v2883_v18 = vsel %vm932_vm6, %v626_v36, %v916_v31  ;;  %v2886_v13 = vmul.f32 %v916_v31, %v2625_v10 }
 0x1e8   :  { %v628_v46 = vsel %vm510_vm7, %v612_v2, 0.0 }
 0x1e9   :  { %v918_v49 = vmul.f32 %v2653_v28, %v628_v46 }
 0x1ea   :  { %1388 = vadd.xlane.f32.xlu0 %v913_v41 }
 0x1eb   :  { %v2890_v16 = vsel %vm934_vm8, %v628_v46, %v918_v49  ;;  %v2893_v26 = vmul.f32 %v2616_v3, %v918_v49 }
 0x1ee   :  { %1392 = vadd.xlane.f32.xlu0 %v915_v7 }
 0x1f2   :  { %1396 = vadd.xlane.f32.xlu0 %v917_v57 }
 0x1f4   :  { %1382 = vadd.xlane.f32.xlu1 %v2564_v39 }
 0x1f6   :  { %1288 = vadd.xlane.f32.xlu0 %v2401_v59 }
 0x1f8   :  { %1386 = vadd.xlane.f32.xlu1 %v912_v37 }
 0x1fc   :  { %1390 = vadd.xlane.f32.xlu1 %v914_v1 }
 0x200   :  { %1394 = vadd.xlane.f32.xlu1 %v916_v31 }
 0x204   :  { %1398 = vadd.xlane.f32.xlu1 %v918_v49 }
 0x208   :  { %1290 = vadd.xlane.f32.xlu1 %v2392_v54 }
 0x20c   :  { %1294 = vadd.xlane.f32.xlu1 %v2435_v8  ;;  %1076 = vperm.xlu0 %1898, %v2794_v53  }
 0x210   :  { %1298 = vadd.xlane.f32.xlu1 %v2536_v29  ;;  %1066 = vperm.xlu0 %1898, %v2812_v5  }
 0x214   :  { %1302 = vadd.xlane.f32.xlu1 %v1279_v23 }
 0x226   :  { %v1012_v24 = vpop.permute.xlu1 %1011 }
 0x227   :  { %v1081_v59 = vsub.f32 %v2359_v34, %v1012_v24 }
 0x229   :  { %v1097_v28 = vmin.f32 %v1081_v59, 0.0 }
 0x22a   :  { %v1002_v36 = vpop.permute.xlu1 %1001 }
 0x22b   :  { %v1115_v41 = vmul.f32 1.442695, %v1097_v28  ;;  %v1079_v54 = vsub.f32 %v2367_v38, %v1002_v36 }
 0x22d   :  { %1916 = vpow2.f32 %v1115_v41  ;;  %v1095_v8 = vmin.f32 %v1079_v54, 0.0 }
 0x22e   :  { %v1017_v7 = vpop.permute.xlu0 %1016 }
 0x22f   :  { %v1111_v57 = vmul.f32 1.442695, %v1095_v8  ;;  %v1082_v29 = vsub.f32 %v2373_v43, %v1017_v7  ;;  %1292 = vadd.xlane.f32.xlu0 %v2454_v14 }
 0x231   :  { %1918 = vpow2.f32 %v1111_v57  ;;  %v1098_v37 = vmin.f32 %v1082_v29, 0.0 }
 0x232   :  { %v1007_v39 = vpop.permute.xlu0 %1006 }
 0x233   :  { %v1117_v31 = vmul.f32 1.442695, %v1098_v37  ;;  %v1080_v1 = vsub.f32 %v2380_v48, %v1007_v39  ;;  %1296 = vadd.xlane.f32.xlu0 %v2551_v32 }
 0x235   :  { %1920 = vpow2.f32 %v1117_v31  ;;  %v1096_v34 = vmin.f32 %v1080_v1, 0.0 }
 0x237   :  { %v1917_v17 = vpop.eup %1916  ;;  %v1113_v38 = vmul.f32 1.442695, %v1096_v34  ;;  %1300 = vadd.xlane.f32.xlu0 %v2588_v50  ;;  %v1032_v22 = vpop.permute.xlu1 %1031 }
 0x238   :  { %v1085_v2 = vsub.f32 %v2420_v4, %v1032_v22  ;;  %v1177_v43 = vmul.f32 %v1917_v17, %v2457_v15 }
 0x239   :  { %1922 = vpow2.f32 %v1113_v38 }
 0x23a   :  { %v1101_v14 = vmin.f32 %v1085_v2, 0.0  ;;  %v1037_v46 = vpop.permute.xlu0 %1036 }
 0x23b   :  { %v1919_v49 = vpop.eup %1918  ;;  %v1086_v23 = vsub.f32 %v2445_v12, %v1037_v46  ;;  %1195 = vadd.xlane.f32.xlu0 %v1177_v43  ;;  %v1022_v48 = vpop.permute.xlu1 %1021 }
 0x23c   :  { %v1123_v32 = vmul.f32 1.442695, %v1101_v14  ;;  %v1083_v24 = vsub.f32 %v2426_v6, %v1022_v48  ;;  %v1175_v59 = vmul.f32 %v1919_v49, %v2403_v60 }
 0x23d   :  { %v1102_v28 = vmin.f32 %v1086_v23, 0.0 }
 0x23e   :  { %1924 = vpow2.f32 %v1123_v32  ;;  %v1099_v50 = vmin.f32 %v1083_v24, 0.0  ;;  %v1027_v36 = vpop.permute.xlu0 %1026  ;;  %1191 = vadd.xlane.f32.xlu1 %v1175_v59 }
 0x23f   :  { %v1921_v4 = vpop.eup %1920  ;;  %v1125_v15 = vmul.f32 1.442695, %v1102_v28  ;;  %v1084_v41 = vsub.f32 %v2469_v20, %v1027_v36 }
 0x240   :  { %v1119_v54 = vmul.f32 1.442695, %v1099_v50  ;;  %v1178_v8 = vmul.f32 %v1921_v4, %v2438_v9 }
 0x241   :  { %1926 = vpow2.f32 %v1125_v15  ;;  %v1100_v12 = vmin.f32 %v1084_v41, 0.0 }
 0x242   :  { %1928 = vpow2.f32 %v1119_v54  ;;  %v1057_v7 = vpop.permute.xlu0 %1056  ;;  %1197 = vadd.xlane.f32.xlu1 %v1178_v8 }
 0x243   :  { %v1923_v6 = vpop.eup %1922  ;;  %v1121_v57 = vmul.f32 1.442695, %v1100_v12  ;;  %v1090_v60 = vsub.f32 %v2582_v47, %v1057_v7  ;;  %v1052_v29 = vpop.permute.xlu1 %1051 }
 0x244   :  { %v1089_v37 = vsub.f32 %v2569_v42, %v1052_v29  ;;  %v1176_v39 = vmul.f32 %v1923_v6, %v2394_v55 }
 0x245   :  { %1930 = vpow2.f32 %v1121_v57  ;;  %v1106_v31 = vmin.f32 %v1090_v60, 0.0  ;;  %v1362_v60 = vld [vmem:[#allocation5 + $0x50] sm:$0xff] }
 0x246   :  { %v1105_v20 = vmin.f32 %v1089_v37, 0.0  ;;  %v1047_v1 = vpop.permute.xlu0 %1046  ;;  %1193 = vadd.xlane.f32.xlu0 %v1176_v39 }
 0x247   :  { %v1133_v9 = vmul.f32 1.442695, %v1106_v31  ;;  %v1088_v34 = vsub.f32 %v2593_v56, %v1047_v1  ;;  %v1042_v17 = vpop.permute.xlu1 %1041 }
 0x248   :  { %v1925_v38 = vpop.eup %1924  ;;  %v1131_v22 = vmul.f32 1.442695, %v1105_v20  ;;  %v1087_v2 = vsub.f32 %v2571_v44, %v1042_v17  ;;  %v1256_v20 = vld [vmem:[#allocation4] sm:$0xff] }
 0x249   :  { %1932 = vpow2.f32 %v1133_v9  ;;  %v1104_v47 = vmin.f32 %v1088_v34, 0.0  ;;  %v1181_v43 = vmul.f32 %v1925_v38, %v2590_v51  ;;  %v1361_v9 = vld [vmem:[#allocation5 + $0x48] sm:$0xff] }
 0x24a   :  { %1934 = vpow2.f32 %v1131_v22  ;;  %v1103_v42 = vmin.f32 %v1087_v2, 0.0  ;;  %v1363_v22 = vld [vmem:[#allocation5 + $0x58] sm:$0xff] }
 0x24b   :  { %v1927_v55 = vpop.eup %1926  ;;  %v1129_v14 = vmul.f32 1.442695, %v1104_v47  ;;  %1203 = vadd.xlane.f32.xlu0 %v1181_v43  ;;  %v1072_v46 = vpop.permute.xlu1 %1071 }
 0x24c   :  { %v1929_v49 = vpop.eup %1928  ;;  %v1127_v23 = vmul.f32 1.442695, %v1103_v42  ;;  %v1093_v48 = vsub.f32 %v2608_v63, %v1072_v46  ;;  %v1182_v56 = vmul.f32 %v1927_v55, %v2577_v45  ;;  %v1365_v42 = vld [vmem:[#allocation5 + $0x68] sm:$0xff] }
 0x24d   :  { %1936 = vpow2.f32 %v1129_v14  ;;  %v1179_v32 = vmul.f32 %v1929_v49, %v2557_v33 }
 0x24e   :  { %1938 = vpow2.f32 %v1127_v23  ;;  %v1109_v24 = vmin.f32 %v1093_v48, 0.0  ;;  %1205 = vadd.xlane.f32.xlu1 %v1182_v56  ;;  %v1367_v48 = vld [vmem:[#allocation5 + $0x78] sm:$0xff] }
 0x24f   :  { %v1931_v59 = vpop.eup %1930  ;;  %1199 = vadd.xlane.f32.xlu0 %v1179_v32  ;;  %v1062_v51 = vpop.permute.xlu1 %1061 }
 0x250   :  { %v1139_v28 = vmul.f32 1.442695, %v1109_v24  ;;  %v1091_v50 = vsub.f32 %v2610_v0, %v1062_v51  ;;  %v1180_v36 = vmul.f32 %v1931_v59, %v2542_v30 }
 0x252   :  { %1940 = vpow2.f32 %v1139_v28  ;;  %v1107_v4 = vmin.f32 %v1091_v50, 0.0  ;;  %1201 = vadd.xlane.f32.xlu1 %v1180_v36  ;;  %v1257_v28 = vld [vmem:[#allocation4 + $0x8] sm:$0xff] }
 0x253   :  { %v1933_v63 = vpop.eup %1932 }
 0x254   :  { %v1935_v15 = vpop.eup %1934  ;;  %v1135_v45 = vmul.f32 1.442695, %v1107_v4  ;;  %v1186_v41 = vmul.f32 %v1933_v63, %v2873_v35  ;;  %v1259_v4 = vld [vmem:[#allocation4 + $0x18] sm:$0xff] }
 0x255   :  { %v1185_v33 = vmul.f32 %v1935_v15, %v2834_v27  ;;  %v1280_v27 = vmul.f32 %v2598_v58, %v2571_v44  ;;  %v1366_v58 = vld [vmem:[#allocation5 + $0x70] sm:$0xff] }
 0x256   :  { %1942 = vpow2.f32 %v1135_v45  ;;  %1213 = vadd.xlane.f32.xlu1 %v1186_v41  ;;  %v1261_v45 = vld [vmem:[#allocation4 + $0x28] sm:$0xff] }
 0x257   :  { %v1937_v54 = vpop.eup %1936  ;;  %1211 = vadd.xlane.f32.xlu0 %v1185_v33 }
 0x258   :  { %v1939_v8 = vpop.eup %1938  ;;  %v1184_v12 = vmul.f32 %v1937_v54, %v2863_v40  ;;  %v1360_v40 = vld [vmem:[#allocation5 + $0x40] sm:$0xff] }
 0x259   :  { %v1183_v0 = vmul.f32 %v1939_v8, %v2605_v62  ;;  %v1263_v8 = vld [vmem:[#allocation4 + $0x38] sm:$0xff] }
 0x25a   :  { %1209 = vadd.xlane.f32.xlu1 %v1184_v12 }
 0x25b   :  { %1207 = vadd.xlane.f32.xlu0 %v1183_v0 }
 0x25c   :  { %v1941_v30 = vpop.eup %1940 }
 0x25d   :  { %v1189_v7 = vmul.f32 %v1941_v30, %v2858_v52 }
 0x25f   :  { %1219 = vadd.xlane.f32.xlu0 %v1189_v7 }
 0x260   :  { %v1943_v6 = vpop.eup %1942 }
 0x261   :  { %v1187_v35 = vmul.f32 %v1943_v6, %v2846_v19  ;;  %v1364_v19 = vld [vmem:[#allocation5 + $0x60] sm:$0xff]  ;;  %v3217_v6 = vld [vmem:[#allocation36_spill] sm:$0xff] }
 0x263   :  { %1215 = vadd.xlane.f32.xlu0 %v1187_v35  ;;  %v3219_v35 = vld [vmem:[#allocation8_spill] sm:$0xff] }
 0x267   :  { %1304 = vadd.xlane.f32.xlu0 %v1280_v27 }
 0x26b   :  { %1308 = vadd.xlane.f32.xlu0 %v2837_v61 }
 0x26f   :  { %1312 = vadd.xlane.f32.xlu0 %v2849_v11  ;;  %v1359_v11 = vld [vmem:[#allocation5 + $0x38] sm:$0xff] }
 0x273   :  { %v1385_v62 = vpop.xlane.xlu0 %1384  ;;  %1316 = vadd.xlane.f32.xlu0 %v2861_v21 }
 0x274   :  { %v1408_v57 = vadd.f32 %v1385_v62, %v1360_v40  ;;  %v3221_v62 = vld [vmem:[#allocation7_spill] sm:$0xff] }
 0x276   :  { %1424 = vst.msk [vmem:[#allocation5 + $0x40] sm:$0xff] %vm28_vm3, %v1408_v57  ;;  %v3222_v57 = vld [vmem:[#allocation9_spill] sm:$0xff] }
 0x277   :  { %v1389_v52 = vpop.xlane.xlu0 %1388 }
 0x278   :  { %v1410_v29 = vadd.f32 %v1389_v52, %v1362_v60  ;;  %v3223_v60 = vsub.f32 %v3221_v62, %v3222_v57  ;;  %v1258_v52 = vld [vmem:[#allocation4 + $0x10] sm:$0xff] }
 0x27a   :  { %1426 = vst.msk [vmem:[#allocation5 + $0x50] sm:$0xff] %vm28_vm3, %v1410_v29 }
 0x27b   :  { %v1393_v37 = vpop.xlane.xlu0 %1392 }
 0x27c   :  { %v1412_v44 = vadd.f32 %v1393_v37, %v1364_v19  ;;  %v3224_v19 = vld [vmem:[#allocation10_spill] sm:$0xff]  ;;  %v3225_v37 = vld [vmem:[#allocation12_spill] sm:$0xff] }
 0x27e   :  { %1428 = vst.msk [vmem:[#allocation5 + $0x60] sm:$0xff] %vm28_vm3, %v1412_v44  ;;  %v3226_v44 = vsub.f32 %v3224_v19, %v3225_v37 }
 0x27f   :  { %v1397_v61 = vpop.xlane.xlu0 %1396 }
 0x280   :  { %v1414_v39 = vadd.f32 %v1397_v61, %v1366_v58  ;;  %v3227_v61 = vld [vmem:[#allocation11_spill] sm:$0xff] }
 0x281   :  { %v1383_v31 = vpop.xlane.xlu1 %1382 }
 0x282   :  { %1430 = vst.msk [vmem:[#allocation5 + $0x70] sm:$0xff] %vm28_vm3, %v1414_v39  ;;  %v1407_v21 = vadd.f32 %v1383_v31, %v1359_v11  ;;  %v3228_v11 = vld [vmem:[#allocation13_spill] sm:$0xff] }
 0x283   :  { %v1289_v1 = vpop.xlane.xlu0 %1288  ;;  %v3229_v39 = vsub.f32 %v3227_v61, %v3228_v11 }
 0x284   :  { %1423 = vst.msk [vmem:[#allocation5 + $0x38] sm:$0xff] %vm28_vm3, %v1407_v21  ;;  %v1320_v34 = vadd.f32 %v1289_v1, %v1256_v20  ;;  %v1262_v21 = vld [vmem:[#allocation4 + $0x30] sm:$0xff] }
 0x285   :  { %v1387_v17 = vpop.xlane.xlu1 %1386  ;;  %v969_v31 = vmul.f32 1.442695, %v3229_v39 }
 0x286   :  { %1336 = vst.msk [vmem:[#allocation4] sm:$0xff] %vm28_vm3, %v1320_v34  ;;  %v1409_v38 = vadd.f32 %v1387_v17, %v1361_v9  ;;  %v1145_v34 = vld [vmem:[#allocation3 + $0x10] sm:$0xff] }
 0x288   :  { %1425 = vst.msk [vmem:[#allocation5 + $0x48] sm:$0xff] %vm28_vm3, %v1409_v38  ;;  %v3230_v38 = vld [vmem:[#allocation14_spill] sm:$0xff] }
 0x289   :  { %v1391_v2 = vpop.xlane.xlu1 %1390 }
 0x28a   :  { %v1411_v47 = vadd.f32 %v1391_v2, %v1363_v22  ;;  %v3231_v22 = vld [vmem:[#allocation15_spill] sm:$0xff] }
 0x28b   :  { %v1077_v43 = vpop.permute.xlu0 %1076  ;;  %v3232_v2 = vsub.f32 %v3230_v38, %v3231_v22 }
 0x28c   :  { %1427 = vst.msk [vmem:[#allocation5 + $0x58] sm:$0xff] %vm28_vm3, %v1411_v47  ;;  %v1094_v55 = vsub.f32 %v2616_v3, %v1077_v43 }
 0x28d   :  { %v1395_v14 = vpop.xlane.xlu1 %1394  ;;  %v979_v47 = vmul.f32 1.442695, %v3232_v2  ;;  %v1485_v2 = vld [vmem:[#allocation5 + $0x10] sm:$0xff] }
 0x28e   :  { %v1110_v46 = vmin.f32 %v1094_v55, 0.0  ;;  %v1413_v49 = vadd.f32 %v1395_v14, %v1365_v42  ;;  %v1143_v55 = vld [vmem:[#allocation3] sm:$0xff] }
 0x28f   :  { %v1067_v23 = vpop.permute.xlu0 %1066 }
 0x290   :  { %v1141_v56 = vmul.f32 1.442695, %v1110_v46  ;;  %1429 = vst.msk [vmem:[#allocation5 + $0x68] sm:$0xff] %vm28_vm3, %v1413_v49  ;;  %v1092_v32 = vsub.f32 %v2625_v10, %v1067_v23  ;;  %v3233_v46 = vld [vmem:[#allocation16_spill] sm:$0xff]  ;;  %v3234_v49 = vld [vmem:[#allocation18_spill] sm:$0xff] }
 0x291   :  { %v1399_v24 = vpop.xlane.xlu1 %1398  ;;  %v3235_v23 = vsub.f32 %v3233_v46, %v3234_v49 }
 0x292   :  { %1944 = vpow2.f32 %v1141_v56  ;;  %v1108_v59 = vmin.f32 %v1092_v32, 0.0  ;;  %v1415_v51 = vadd.f32 %v1399_v24, %v1367_v48  ;;  %v3236_v32 = vld [vmem:[#allocation17_spill] sm:$0xff]  ;;  %v3237_v24 = vld [vmem:[#allocation19_spill] sm:$0xff] }
 0x293   :  { %v981_v48 = vmul.f32 1.442695, %v3235_v23 }
 0x294   :  { %v1137_v50 = vmul.f32 1.442695, %v1108_v59  ;;  %1431 = vst.msk [vmem:[#allocation5 + $0x78] sm:$0xff] %vm28_vm3, %v1415_v51  ;;  %v3238_v59 = vsub.f32 %v3236_v32, %v3237_v24  ;;  %v1469_v32 = vld [vmem:[#allocation2 + $0x10] sm:$0xff] }
 0x295   :  { %v1291_v36 = vpop.xlane.xlu1 %1290 }
 0x296   :  { %1946 = vpow2.f32 %v1137_v50  ;;  %v1321_v3 = vadd.f32 %v1291_v36, %v1257_v28  ;;  %v975_v51 = vmul.f32 1.442695, %v3238_v59 }
 0x298   :  { %1337 = vst.msk [vmem:[#allocation4 + $0x8] sm:$0xff] %vm28_vm3, %v1321_v3  ;;  %v1146_v3 = vld [vmem:[#allocation3 + $0x18] sm:$0xff] }
 0x299   :  { %v1295_v63 = vpop.xlane.xlu1 %1294 }
 0x29a   :  { %v1323_v15 = vadd.f32 %v1295_v63, %v1259_v4  ;;  %v3239_v63 = vld [vmem:[#allocation20_spill] sm:$0xff] }
 0x29c   :  { %v1945_v41 = vpop.eup %1944  ;;  %1339 = vst.msk [vmem:[#allocation4 + $0x18] sm:$0xff] %vm28_vm3, %v1323_v15  ;;  %v3240_v15 = vld [vmem:[#allocation21_spill] sm:$0xff] }
 0x29d   :  { %v1299_v10 = vpop.xlane.xlu1 %1298  ;;  %v1190_v33 = vmul.f32 %v1945_v41, %v2890_v16  ;;  %v3218_v16 = vld [vmem:[#allocation6_spill] sm:$0xff] }
 0x29e   :  { %v1325_v54 = vadd.f32 %v1299_v10, %v1261_v45  ;;  %v3220_v27 = vsub.f32 %v3218_v16, %v3219_v35  ;;  %v3241_v45 = vsub.f32 %v3239_v63, %v3240_v15  ;;  %v3245_v16 = vld [vmem:[#allocation23_spill] sm:$0xff]  ;;  %v3246_v35 = vld [vmem:[#allocation25_spill] sm:$0xff]  ;;  %v3257_v63 = vld [vmem:[#allocation34_spill] sm:$0xff] }
 0x29f   :  { %1221 = vadd.xlane.f32.xlu1 %v1190_v33  ;;  %v3258_v15 = vld [vmem:[#allocation35_spill] sm:$0xff] }
 0x2a0   :  { %v1947_v12 = vpop.eup %1946  ;;  %1341 = vst.msk [vmem:[#allocation4 + $0x28] sm:$0xff] %vm28_vm3, %v1325_v54  ;;  %v971_v40 = vmul.f32 1.442695, %v3220_v27  ;;  %v977_v41 = vmul.f32 1.442695, %v3241_v45  ;;  %v3247_v27 = vsub.f32 %v3245_v16, %v3246_v35  ;;  %v3259_v45 = vsub.f32 %v3257_v63, %v3258_v15 }
 0x2a1   :  { %v1303_v0 = vpop.xlane.xlu1 %1302  ;;  %v1188_v30 = vmul.f32 %v1947_v12, %v2883_v18  ;;  %v967_v18 = vmul.f32 1.442695, %v3223_v60  ;;  %v3242_v12 = vld [vmem:[#allocation22_spill] sm:$0xff] }
 0x2a2   :  { %v1327_v7 = vadd.f32 %v1303_v0, %v1263_v8  ;;  %1948 = vpow2.f32 %v971_v40  ;;  %v1144_v8 = vld [vmem:[#allocation3 + $0x8] sm:$0xff]  ;;  %v3243_v0 = vld [vmem:[#allocation24_spill] sm:$0xff]  ;;  %v987_v40 = vmul.f32 1.442695, %v3247_v27  ;;  %v3248_v60 = vld [vmem:[#allocation26_spill] sm:$0xff] }
 0x2a3   :  { %1217 = vadd.xlane.f32.xlu1 %v1188_v30  ;;  %1950 = vpow2.f32 %v967_v18  ;;  %v3244_v30 = vsub.f32 %v3242_v12, %v3243_v0  ;;  %v3249_v18 = vld [vmem:[#allocation28_spill] sm:$0xff]  ;;  %v1154_v12 = vld [vmem:[#allocation3 + $0x58] sm:$0xff] }
 0x2a4   :  { %1343 = vst.msk [vmem:[#allocation4 + $0x38] sm:$0xff] %vm28_vm3, %v1327_v7  ;;  %v1153_v27 = vld [vmem:[#allocation3 + $0x50] sm:$0xff] }
 0x2a5   :  { %v989_v7 = vmul.f32 1.442695, %v3244_v30  ;;  %v1467_v30 = vld [vmem:[#allocation2] sm:$0xff] }
 0x2a7   :  { %1306 = vadd.xlane.f32.xlu1 %v3217_v6 }
 0x2ab   :  { %1310 = vadd.xlane.f32.xlu1 %v2876_v25  ;;  %v973_v25 = vmul.f32 1.442695, %v3226_v44 }
 0x2ac   :  { %v1949_v1 = vpop.eup %1948 }
 0x2ad   :  { %1952 = vpow2.f32 %v973_v25  ;;  %v1951_v43 = vpop.eup %1950  ;;  %v1161_v42 = vmul.f32 %v1949_v1, %v1145_v34  ;;  %v1150_v1 = vld [vmem:[#allocation3 + $0x38] sm:$0xff] }
 0x2ae   :  { %1954 = vpow2.f32 %v969_v31  ;;  %v1159_v28 = vmul.f32 %v1951_v43, %v1143_v55  ;;  %v3255_v43 = vld [vmem:[#allocation32_spill] sm:$0xff] }
 0x2af   :  { %1314 = vadd.xlane.f32.xlu1 %v2886_v13  ;;  %v1260_v13 = vld [vmem:[#allocation4 + $0x20] sm:$0xff]  ;;  %1956 = vpow2.f32 %v979_v47  ;;  %v3254_v47 = vld [vmem:[#allocation31_spill] sm:$0xff] }
 0x2b0   :  { %1958 = vpow2.f32 %v981_v48 }
 0x2b1   :  { %1960 = vpow2.f32 %v975_v51  ;;  %v1501_v51 = vmul.f32 %v1485_v2, %v1469_v32  ;;  %v1468_v2 = vld [vmem:[#allocation2 + $0x8] sm:$0xff] }
 0x2b2   :  { %1962 = vpow2.f32 %v977_v41  ;;  %v991_v41 = vmul.f32 1.442695, %v3259_v45 }
 0x2b3   :  { %1318 = vadd.xlane.f32.xlu1 %v2893_v26  ;;  %1964 = vpow2.f32 %v989_v7  ;;  %v1451_v7 = vld [vmem:[#allocation4] sm:$0xff] }
 0x2b7   :  { %v1953_v50 = vpop.eup %1952 }
 0x2b8   :  { %v1162_v10 = vmul.f32 %v1953_v50, %v1146_v3  ;;  %v1955_v33 = vpop.eup %1954 }
 0x2b9   :  { %v1160_v57 = vmul.f32 %v1955_v33, %v1144_v8  ;;  %v1957_v44 = vpop.eup %1956 }
 0x2bc   :  { %v1293_v29 = vpop.xlane.xlu0 %1292 }
 0x2bd   :  { %v1322_v58 = vadd.f32 %v1293_v29, %v1258_v52  ;;  %v3250_v52 = vsub.f32 %v3248_v60, %v3249_v18  ;;  %v1486_v60 = vld [vmem:[#allocation5 + $0x18] sm:$0xff] }
 0x2bf   :  { %1338 = vst.msk [vmem:[#allocation4 + $0x10] sm:$0xff] %vm28_vm3, %v1322_v58  ;;  %v985_v29 = vmul.f32 1.442695, %v3250_v52  ;;  %v1149_v58 = vld [vmem:[#allocation3 + $0x30] sm:$0xff] }
 0x2c0   :  { %v1297_v26 = vpop.xlane.xlu0 %1296 }
 0x2c1   :  { %v1324_v20 = vadd.f32 %v1297_v26, %v1260_v13  ;;  %v3251_v13 = vld [vmem:[#allocation27_spill] sm:$0xff]  ;;  %v3252_v26 = vld [vmem:[#allocation29_spill] sm:$0xff] }
 0x2c2   :  { %v3253_v61 = vsub.f32 %v3251_v13, %v3252_v26  ;;  %v1152_v26 = vld [vmem:[#allocation3 + $0x48] sm:$0xff] }
 0x2c3   :  { %1340 = vst.msk [vmem:[#allocation4 + $0x20] sm:$0xff] %vm28_vm3, %v1324_v20  ;;  %v1959_v20 = vpop.eup %1958 }
 0x2c4   :  { %v1301_v9 = vpop.xlane.xlu0 %1300  ;;  %v983_v11 = vmul.f32 1.442695, %v3253_v61  ;;  %v1166_v46 = vmul.f32 %v1959_v20, %v1150_v1  ;;  %v1151_v61 = vld [vmem:[#allocation3 + $0x40] sm:$0xff] }
 0x2c5   :  { %v1326_v17 = vadd.f32 %v1301_v9, %v1262_v21  ;;  %v1165_v21 = vmul.f32 %v1957_v44, %v1149_v58  ;;  %v1961_v9 = vpop.eup %1960 }
 0x2c6   :  { %v1963_v49 = vpop.eup %1962 }
 0x2c7   :  { %1342 = vst.msk [vmem:[#allocation4 + $0x30] sm:$0xff] %vm28_vm3, %v1326_v17  ;;  %v1147_v17 = vld [vmem:[#allocation3 + $0x20] sm:$0xff]  ;;  %v1965_v3 = vpop.eup %1964 }
 0x2c8   :  { %v1196_v14 = vpop.xlane.xlu0 %1195  ;;  %v1163_v48 = vmul.f32 %v1961_v9, %v1147_v17 }
 0x2c9   :  { %v1225_v56 = vadd.f32 %v1196_v14, %v1161_v42  ;;  %v3256_v42 = vsub.f32 %v3254_v47, %v3255_v43 }
 0x2cb   :  { %1242 = vst.msk [vmem:[#allocation3 + $0x10] sm:$0xff] %vm28_vm3, %v1225_v56  ;;  %v1192_v36 = vpop.xlane.xlu1 %1191  ;;  %v995_v55 = vmul.f32 1.442695, %v3256_v42  ;;  %v1148_v56 = vld [vmem:[#allocation3 + $0x28] sm:$0xff] }
 0x2cc   :  { %v1223_v4 = vadd.f32 %v1192_v36, %v1159_v28  ;;  %v1453_v28 = vld [vmem:[#allocation4 + $0x10] sm:$0xff]  ;;  %v1164_v33 = vmul.f32 %v1963_v49, %v1148_v56 }
 0x2ce   :  { %1240 = vst.msk [vmem:[#allocation3] sm:$0xff] %vm28_vm3, %v1223_v4  ;;  %v1483_v4 = vld [vmem:[#allocation5] sm:$0xff] }
 0x2cf   :  { %v1198_v54 = vpop.xlane.xlu1 %1197 }
 0x2d0   :  { %v1226_v6 = vadd.f32 %v1198_v54, %v1162_v10 }
 0x2d2   :  { %v1533_v62 = vld [vmem:[#allocation3 + $0x10] sm:$0xff]  ;;  %1243 = vst.msk [vmem:[#allocation3 + $0x18] sm:$0xff] %vm28_vm3, %v1226_v6  ;;  %v1517_v6 = vsub.f32 %v1453_v28, %v1501_v51 }
 0x2d3   :  { %v1549_v19 = vadd.f32 1e-10, %v1533_v62  ;;  %v1194_v37 = vpop.xlane.xlu0 %1193  ;;  %v1499_v62 = vmul.f32 %v1483_v4, %v1467_v30 }
 0x2d4   :  { %v1224_v25 = vadd.f32 %v1194_v37, %v1160_v57 }
 0x2d5   :  { %1966 = vlog2.f32 %v1549_v19  ;;  %v1531_v39 = vld [vmem:[#allocation3] sm:$0xff]  ;;  %v1515_v37 = vsub.f32 %v1451_v7, %v1499_v62  ;;  %v1490_v62 = vld [vmem:[#allocation5 + $0x38] sm:$0xff] }
 0x2d6   :  { %1968 = vpow2.f32 %v987_v40  ;;  %v1547_v31 = vadd.f32 1e-10, %v1531_v39  ;;  %1241 = vst.msk [vmem:[#allocation3 + $0x8] sm:$0xff] %vm28_vm3, %v1224_v25  ;;  %v1454_v39 = vld [vmem:[#allocation4 + $0x18] sm:$0xff]  ;;  %v1155_v7 = vld [vmem:[#allocation3 + $0x60] sm:$0xff] }
 0x2d7   :  { %1970 = vpow2.f32 %v985_v29  ;;  %v1170_v29 = vmul.f32 %v1965_v3, %v1154_v12 }
 0x2d8   :  { %1972 = vlog2.f32 %v1547_v31  ;;  %v1204_v34 = vpop.xlane.xlu0 %1203  ;;  %v2012_v31 = vld [vmem:[%s3151_s4 + $0x10] sm:$0xff] }
 0x2d9   :  { %1974 = vpow2.f32 %v983_v11  ;;  %v1534_v38 = vld [vmem:[#allocation3 + $0x18] sm:$0xff]  ;;  %v1229_v22 = vadd.f32 %v1204_v34, %v1165_v21 }
 0x2da   :  { %v1550_v14 = vadd.f32 1e-10, %v1534_v38  ;;  %v1470_v11 = vld [vmem:[#allocation2 + $0x18] sm:$0xff] }
 0x2db   :  { %1246 = vst.msk [vmem:[#allocation3 + $0x30] sm:$0xff] %vm28_vm3, %v1229_v22  ;;  %v1206_v23 = vpop.xlane.xlu1 %1205  ;;  %v1502_v9 = vmul.f32 %v1486_v60, %v1470_v11  ;;  %v1487_v60 = vld [vmem:[#allocation5 + $0x20] sm:$0xff] }
 0x2dc   :  { %1976 = vlog2.f32 %v1550_v14  ;;  %v1230_v24 = vadd.f32 %v1206_v23, %v1166_v46  ;;  %v1200_v59 = vpop.xlane.xlu0 %1199  ;;  %v2013_v46 = vld [vmem:[%s3151_s4] sm:$0xff] }
 0x2dd   :  { %v1532_v50 = vld [vmem:[#allocation3 + $0x8] sm:$0xff]  ;;  %v1227_v36 = vadd.f32 %v1200_v59, %v1163_v48  ;;  %1978 = vpow2.f32 %v995_v55  ;;  %v1518_v14 = vsub.f32 %v1454_v39, %v1502_v9  ;;  %v1455_v11 = vld [vmem:[#allocation4 + $0x20] sm:$0xff] }
 0x2de   :  { %v1548_v10 = vadd.f32 1e-10, %v1532_v50  ;;  %1247 = vst.msk [vmem:[#allocation3 + $0x38] sm:$0xff] %vm28_vm3, %v1230_v24  ;;  %v1484_v24 = vld [vmem:[#allocation5 + $0x8] sm:$0xff]  ;;  %v1157_v50 = vld [vmem:[#allocation3 + $0x70] sm:$0xff] }
 0x2df   :  { %v1967_v54 = vpop.eup %1966  ;;  %1244 = vst.msk [vmem:[#allocation3 + $0x20] sm:$0xff] %vm28_vm3, %v1227_v36  ;;  %v1202_v8 = vpop.xlane.xlu1 %1201  ;;  %v1452_v59 = vld [vmem:[#allocation4 + $0x8] sm:$0xff]  ;;  %v1500_v36 = vmul.f32 %v1484_v24, %v1468_v2 }
 0x2e0   :  { %v1969_v0 = vpop.eup %1968  ;;  %v1568_v16 = vmul.f32 0.6931472, %v1967_v54  ;;  %1980 = vlog2.f32 %v1548_v10  ;;  %v1228_v35 = vadd.f32 %v1202_v8, %v1164_v33  ;;  %v2014_v33 = vld [vmem:[%s3151_s4 + $0x18] sm:$0xff] }
 0x2e1   :  { %v1971_v40 = vpop.eup %1970  ;;  %1982 = vpow2.f32 %v991_v41  ;;  %v1169_v13 = vmul.f32 %v1969_v0, %v1153_v27  ;;  %v1489_v41 = vld [vmem:[#allocation5 + $0x30] sm:$0xff]  ;;  %v1516_v10 = vsub.f32 %v1452_v59, %v1500_v36 }
 0x2e2   :  { %v1973_v57 = vpop.eup %1972  ;;  %v1597_v18 = vsub.f32 %v1568_v16, %v1517_v6  ;;  %v1537_v52 = vld [vmem:[#allocation3 + $0x30] sm:$0xff]  ;;  %1245 = vst.msk [vmem:[#allocation3 + $0x28] sm:$0xff] %vm28_vm3, %v1228_v35  ;;  %v1168_v42 = vmul.f32 %v1971_v40, %v1152_v26  ;;  %v1471_v26 = vld [vmem:[#allocation2 + $0x20] sm:$0xff] }
 0x2e3   :  { %v1975_v19 = vpop.eup %1974  ;;  %v1564_v44 = vmul.f32 0.6931472, %v1973_v57  ;;  %v1553_v25 = vadd.f32 1e-10, %v1537_v52  ;;  %v1214_v58 = vpop.xlane.xlu1 %1213  ;;  %v1473_v6 = vld [vmem:[#allocation2 + $0x30] sm:$0xff] }
 0x2e4   :  { %v1613_v20 = vmul.f32 %v2012_v31, %v1597_v18  ;;  %v1234_v21 = vadd.f32 %v1214_v58, %v1170_v29  ;;  %v1212_v1 = vpop.xlane.xlu0 %1211  ;;  %v1167_v55 = vmul.f32 %v1975_v19, %v1151_v61  ;;  %v1457_v16 = vld [vmem:[#allocation4 + $0x30] sm:$0xff]  ;;  %v1505_v40 = vmul.f32 %v1489_v41, %v1473_v6  ;;  %v2015_v18 = vld [vmem:[%s3151_s4 + $0x8] sm:$0xff]  ;;  %v1475_v6 = vld [vmem:[#allocation2 + $0x40] sm:$0xff] }
 0x2e5   :  { %v1595_v34 = vsub.f32 %v1564_v44, %v1515_v37  ;;  %1984 = vlog2.f32 %v1553_v25  ;;  %v1538_v17 = vld [vmem:[#allocation3 + $0x38] sm:$0xff]  ;;  %v1233_v38 = vadd.f32 %v1212_v1, %v1169_v13 }
 0x2e6   :  { %v1977_v22 = vpop.eup %1976  ;;  %1629 = vst.msk [vmem:[%s3153_s6 + $0x10] sm:$0xff] %vm28_vm3, %v1613_v20  ;;  %v1554_v47 = vadd.f32 1e-10, %v1538_v17  ;;  %v1535_v43 = vld [vmem:[#allocation3 + $0x20] sm:$0xff]  ;;  %1251 = vst.msk [vmem:[#allocation3 + $0x58] sm:$0xff] %vm28_vm3, %v1234_v21  ;;  %v1474_v37 = vld [vmem:[#allocation2 + $0x38] sm:$0xff]  ;;  %v1521_v25 = vsub.f32 %v1457_v16, %v1505_v40  ;;  %v1503_v21 = vmul.f32 %v1487_v60, %v1471_v26 }
 0x2e7   :  { %v1611_v49 = vmul.f32 %v2013_v46, %v1595_v34  ;;  %v1570_v23 = vmul.f32 0.6931472, %v1977_v22  ;;  %v1551_v48 = vadd.f32 1e-10, %v1535_v43  ;;  %1250 = vst.msk [vmem:[#allocation3 + $0x50] sm:$0xff] %vm28_vm3, %v1233_v38  ;;  %v1210_v56 = vpop.xlane.xlu1 %1209  ;;  %v1979_v32 = vpop.eup %1978  ;;  %v1458_v44 = vld [vmem:[#allocation4 + $0x38] sm:$0xff]  ;;  %v1506_v61 = vmul.f32 %v1490_v62, %v1474_v37 }
 0x2e8   :  { %1986 = vlog2.f32 %v1554_v47  ;;  %v1232_v51 = vadd.f32 %v1210_v56, %v1168_v42  ;;  %v1208_v28 = vpop.xlane.xlu0 %1207  ;;  %v1173_v12 = vmul.f32 %v1979_v32, %v1157_v50  ;;  %v1472_v20 = vld [vmem:[#allocation2 + $0x28] sm:$0xff]  ;;  %v1264_v17 = vld [vmem:[#allocation4 + $0x40] sm:$0xff]  ;;  %v2017_v50 = vld [vmem:[%s3151_s4 + $0x38] sm:$0xff] }
 0x2e9   :  { %1627 = vst.msk [vmem:[%s3153_s6] sm:$0xff] %vm28_vm3, %v1611_v49  ;;  %v1598_v3 = vsub.f32 %v1570_v23, %v1518_v14  ;;  %1988 = vlog2.f32 %v1551_v48  ;;  %v1536_v4 = vld [vmem:[#allocation3 + $0x28] sm:$0xff]  ;;  %v1231_v63 = vadd.f32 %v1208_v28, %v1167_v55  ;;  %v1522_v22 = vsub.f32 %v1458_v44, %v1506_v61  ;;  %v2016_v14 = vld [vmem:[%s3151_s4 + $0x30] sm:$0xff] }
 0x2ea   :  { %v1981_v15 = vpop.eup %1980  ;;  %v1552_v45 = vadd.f32 1e-10, %v1536_v4  ;;  %1249 = vst.msk [vmem:[#allocation3 + $0x48] sm:$0xff] %vm28_vm3, %v1232_v51  ;;  %v1488_v43 = vld [vmem:[#allocation5 + $0x28] sm:$0xff]  ;;  %v1519_v55 = vsub.f32 %v1455_v11, %v1503_v21  ;;  %v1266_v51 = vld [vmem:[#allocation4 + $0x50] sm:$0xff] }
 0x2eb   :  { %v1614_v54 = vmul.f32 %v2014_v33, %v1598_v3  ;;  %v1566_v8 = vmul.f32 0.6931472, %v1981_v15  ;;  %1248 = vst.msk [vmem:[#allocation3 + $0x40] sm:$0xff] %vm28_vm3, %v1231_v63  ;;  %v1983_v0 = vpop.eup %1982  ;;  %v1456_v42 = vld [vmem:[#allocation4 + $0x28] sm:$0xff]  ;;  %v1504_v48 = vmul.f32 %v1488_v43, %v1472_v20  ;;  %v2018_v63 = vld [vmem:[%s3151_s4 + $0x20] sm:$0xff]  ;;  %v1493_v40 = vld [vmem:[#allocation5 + $0x50] sm:$0xff] }
 0x2ec   :  { %1990 = vlog2.f32 %v1552_v45  ;;  %v1220_v30 = vpop.xlane.xlu0 %1219  ;;  %v1171_v19 = vmul.f32 %v1983_v0, %v1155_v7  ;;  %v1491_v33 = vld [vmem:[#allocation5 + $0x40] sm:$0xff]  ;;  %v2019_v0 = vld [vmem:[%s3151_s4 + $0x28] sm:$0xff]  ;;  %v1481_v43 = vld [vmem:[#allocation2 + $0x70] sm:$0xff] }
 0x2ed   :  { %1630 = vst.msk [vmem:[%s3153_s6 + $0x18] sm:$0xff] %vm28_vm3, %v1614_v54  ;;  %v1596_v35 = vsub.f32 %v1566_v8, %v1516_v10  ;;  %v1237_v27 = vadd.f32 %v1220_v30, %v1173_v12  ;;  %v1520_v28 = vsub.f32 %v1456_v42, %v1504_v48  ;;  %v1268_v12 = vld [vmem:[#allocation4 + $0x60] sm:$0xff] }
 0x2ee   :  { %v1541_v29 = vld [vmem:[#allocation3 + $0x50] sm:$0xff]  ;;  %v2022_v48 = vld [vmem:[%s3151_s4 + $0x60] sm:$0xff] }
 0x2ef   :  { %v1985_v57 = vpop.eup %1984  ;;  %v1612_v52 = vmul.f32 %v2015_v18, %v1596_v35  ;;  %1254 = vst.msk [vmem:[#allocation3 + $0x70] sm:$0xff] %vm28_vm3, %v1237_v27  ;;  %v1557_v9 = vadd.f32 1e-10, %v1541_v29  ;;  %v1507_v35 = vmul.f32 %v1491_v33, %v1475_v6  ;;  %v1477_v29 = vld [vmem:[#allocation2 + $0x50] sm:$0xff] }
 0x2f0   :  { %v1576_v58 = vmul.f32 0.6931472, %v1985_v57  ;;  %v1216_v13 = vpop.xlane.xlu0 %1215  ;;  %v1270_v57 = vld [vmem:[#allocation4 + $0x70] sm:$0xff]  ;;  %v1509_v44 = vmul.f32 %v1493_v40, %v1477_v29  ;;  %v1269_v29 = vld [vmem:[#allocation4 + $0x68] sm:$0xff] }
 0x2f1   :  { %1628 = vst.msk [vmem:[%s3153_s6 + $0x8] sm:$0xff] %vm28_vm3, %v1612_v52  ;;  %v1235_v39 = vadd.f32 %v1216_v13, %v1171_v19 }
 0x2f2   :  { %v1987_v31 = vpop.eup %1986  ;;  %v1601_v1 = vsub.f32 %v1576_v58, %v1521_v25  ;;  %v1539_v34 = vld [vmem:[#allocation3 + $0x40] sm:$0xff] }
 0x2f3   :  { %v1989_v38 = vpop.eup %1988  ;;  %v1578_v2 = vmul.f32 0.6931472, %v1987_v31  ;;  %v1555_v47 = vadd.f32 1e-10, %v1539_v34  ;;  %1252 = vst.msk [vmem:[#allocation3 + $0x60] sm:$0xff] %vm28_vm3, %v1235_v39  ;;  %v1495_v58 = vld [vmem:[#allocation5 + $0x60] sm:$0xff] }
 0x2f4   :  { %v1617_v46 = vmul.f32 %v2016_v14, %v1601_v1  ;;  %v1572_v49 = vmul.f32 0.6931472, %v1989_v38  ;;  %v1305_v23 = vpop.xlane.xlu0 %1304  ;;  %v1479_v39 = vld [vmem:[#allocation2 + $0x60] sm:$0xff]  ;;  %v2021_v38 = vld [vmem:[%s3151_s4 + $0x50] sm:$0xff] }
 0x2f5   :  { %v1602_v56 = vsub.f32 %v1578_v2, %v1522_v22  ;;  %1992 = vlog2.f32 %v1555_v47  ;;  %v1328_v32 = vadd.f32 %v1305_v23, %v1264_v17  ;;  %v2020_v31 = vld [vmem:[%s3151_s4 + $0x40] sm:$0xff]  ;;  %v1511_v21 = vmul.f32 %v1495_v58, %v1479_v39 }
 0x2f6   :  { %v1991_v24 = vpop.eup %1990  ;;  %1633 = vst.msk [vmem:[%s3153_s6 + $0x30] sm:$0xff] %vm28_vm3, %v1617_v46  ;;  %v1599_v59 = vsub.f32 %v1572_v49, %v1519_v55  ;;  %1994 = vlog2.f32 %v1557_v9  ;;  %v1545_v4 = vld [vmem:[#allocation3 + $0x70] sm:$0xff] }
 0x2f7   :  { %v1618_v36 = vmul.f32 %v2017_v50, %v1602_v56  ;;  %v1574_v3 = vmul.f32 0.6931472, %v1991_v24  ;;  %1344 = vst.msk [vmem:[#allocation4 + $0x40] sm:$0xff] %vm28_vm3, %v1328_v32  ;;  %v1561_v54 = vadd.f32 1e-10, %v1545_v4  ;;  %v1497_v9 = vld [vmem:[#allocation5 + $0x70] sm:$0xff] }
 0x2f8   :  { %v1615_v15 = vmul.f32 %v2018_v63, %v1599_v59  ;;  %v1309_v45 = vpop.xlane.xlu0 %1308  ;;  %v1513_v55 = vmul.f32 %v1497_v9, %v1481_v43  ;;  %v2023_v24 = vld [vmem:[%s3151_s4 + $0x70] sm:$0xff] }
 0x2f9   :  { %1634 = vst.msk [vmem:[%s3153_s6 + $0x38] sm:$0xff] %vm28_vm3, %v1618_v36  ;;  %v1600_v41 = vsub.f32 %v1574_v3, %v1520_v28  ;;  %v1330_v10 = vadd.f32 %v1309_v45, %v1266_v51  ;;  %v3260_v51 = vld [vmem:[#allocation30_spill] sm:$0xff]  ;;  %v3261_v36 = vld [vmem:[#allocation33_spill] sm:$0xff]  ;;  %v1540_v45 = vld [vmem:[#allocation3 + $0x48] sm:$0xff] }
 0x2fa   :  { %1631 = vst.msk [vmem:[%s3153_s6 + $0x20] sm:$0xff] %vm28_vm3, %v1615_v15  ;;  %v1543_v8 = vld [vmem:[#allocation3 + $0x60] sm:$0xff]  ;;  %v966_v28 = vsub.f32 %v3260_v51, %v2794_v53  ;;  %v964_v3 = vsub.f32 %v3261_v36, %v2812_v5  ;;  %v1158_v15 = vld [vmem:[#allocation3 + $0x78] sm:$0xff]  ;;  %v1265_v5 = vld [vmem:[#allocation4 + $0x48] sm:$0xff] }
 0x2fb   :  { %v1616_v30 = vmul.f32 %v2019_v0, %v1600_v41  ;;  %v1559_v7 = vadd.f32 1e-10, %v1543_v8  ;;  %1346 = vst.msk [vmem:[#allocation4 + $0x50] sm:$0xff] %vm28_vm3, %v1330_v10  ;;  %v1542_v0 = vld [vmem:[#allocation3 + $0x58] sm:$0xff] }
 0x2fc   :  { %v1313_v16 = vpop.xlane.xlu0 %1312  ;;  %v997_v50 = vmul.f32 1.442695, %v966_v28  ;;  %v993_v4 = vmul.f32 1.442695, %v964_v3  ;;  %v1558_v6 = vadd.f32 1e-10, %v1542_v0 }
 0x2fd   :  { %1632 = vst.msk [vmem:[%s3153_s6 + $0x28] sm:$0xff] %vm28_vm3, %v1616_v30  ;;  %1996 = vlog2.f32 %v1559_v7  ;;  %v1332_v27 = vadd.f32 %v1313_v16, %v1268_v12  ;;  %v1556_v12 = vadd.f32 1e-10, %v1540_v45  ;;  %v1482_v51 = vld [vmem:[#allocation2 + $0x78] sm:$0xff] }
 0x2fe   :  { %1998 = vlog2.f32 %v1561_v54  ;;  %v1459_v62 = vld [vmem:[#allocation4 + $0x40] sm:$0xff]  ;;  %v1156_v54 = vld [vmem:[#allocation3 + $0x68] sm:$0xff] }
 0x2ff   :  { %v1993_v60 = vpop.eup %1992  ;;  %v1523_v18 = vsub.f32 %v1459_v62, %v1507_v35  ;;  %1348 = vst.msk [vmem:[#allocation4 + $0x60] sm:$0xff] %vm28_vm3, %v1332_v27  ;;  %2000 = vpow2.f32 %v997_v50  ;;  %v1267_v27 = vld [vmem:[#allocation4 + $0x58] sm:$0xff] }
 0x300   :  { %v1995_v52 = vpop.eup %1994  ;;  %v1580_v19 = vmul.f32 0.6931472, %v1993_v60  ;;  %v1317_v37 = vpop.xlane.xlu0 %1316  ;;  %2002 = vpow2.f32 %v993_v4  ;;  %v1492_v60 = vld [vmem:[#allocation5 + $0x48] sm:$0xff] }
 0x301   :  { %v1334_v25 = vadd.f32 %v1317_v37, %v1270_v57  ;;  %v1584_v61 = vmul.f32 0.6931472, %v1995_v52  ;;  %2004 = vlog2.f32 %v1556_v12 }
 0x302   :  { %v1603_v13 = vsub.f32 %v1580_v19, %v1523_v18  ;;  %v1461_v26 = vld [vmem:[#allocation4 + $0x50] sm:$0xff]  ;;  %2006 = vlog2.f32 %v1558_v6 }
 0x303   :  { %v1525_v11 = vsub.f32 %v1461_v26, %v1509_v44  ;;  %1350 = vst.msk [vmem:[#allocation4 + $0x70] sm:$0xff] %vm28_vm3, %v1334_v25  ;;  %v1476_v44 = vld [vmem:[#allocation2 + $0x48] sm:$0xff]  ;;  %v1494_v26 = vld [vmem:[#allocation5 + $0x58] sm:$0xff] }
 0x304   :  { %v1619_v20 = vmul.f32 %v2020_v31, %v1603_v13  ;;  %v1508_v58 = vmul.f32 %v1492_v60, %v1476_v44 }
 0x305   :  { %v1605_v1 = vsub.f32 %v1584_v61, %v1525_v11  ;;  %v1271_v11 = vld [vmem:[#allocation4 + $0x78] sm:$0xff] }
 0x306   :  { %1635 = vst.msk [vmem:[%s3153_s6 + $0x40] sm:$0xff] %vm28_vm3, %v1619_v20  ;;  %v1463_v34 = vld [vmem:[#allocation4 + $0x60] sm:$0xff] }
 0x307   :  { %v1997_v17 = vpop.eup %1996  ;;  %v1621_v22 = vmul.f32 %v2021_v38, %v1605_v1  ;;  %v1527_v2 = vsub.f32 %v1463_v34, %v1511_v21  ;;  %v1478_v21 = vld [vmem:[#allocation2 + $0x58] sm:$0xff]  ;;  %v1496_v38 = vld [vmem:[#allocation5 + $0x68] sm:$0xff] }
 0x308   :  { %v1999_v47 = vpop.eup %1998  ;;  %v1588_v42 = vmul.f32 0.6931472, %v1997_v17  ;;  %v1510_v9 = vmul.f32 %v1494_v26, %v1478_v21 }
 0x309   :  { %1637 = vst.msk [vmem:[%s3153_s6 + $0x50] sm:$0xff] %vm28_vm3, %v1621_v22  ;;  %v1592_v49 = vmul.f32 0.6931472, %v1999_v47  ;;  %v2001_v63 = vpop.eup %2000 }
 0x30a   :  { %v1607_v14 = vsub.f32 %v1588_v42, %v1527_v2  ;;  %v1465_v46 = vld [vmem:[#allocation4 + $0x70] sm:$0xff]  ;;  %v1174_v41 = vmul.f32 %v2001_v63, %v1158_v15  ;;  %v2003_v10 = vpop.eup %2002  ;;  %v2024_v2 = vld [vmem:[%s3151_s4 + $0x48] sm:$0xff] }
 0x30b   :  { %v1529_v23 = vsub.f32 %v1465_v46, %v1513_v55  ;;  %v1172_v53 = vmul.f32 %v2003_v10, %v1156_v54  ;;  %v2005_v37 = vpop.eup %2004  ;;  %v1480_v55 = vld [vmem:[#allocation2 + $0x68] sm:$0xff]  ;;  %v2027_v10 = vld [vmem:[%s3151_s4 + $0x78] sm:$0xff] }
 0x30c   :  { %v1623_v56 = vmul.f32 %v2022_v48, %v1607_v14  ;;  %v1582_v39 = vmul.f32 0.6931472, %v2005_v37  ;;  %v2007_v20 = vpop.eup %2006  ;;  %v1512_v14 = vmul.f32 %v1496_v38, %v1480_v55  ;;  %v2026_v15 = vld [vmem:[%s3151_s4 + $0x68] sm:$0xff] }
 0x30d   :  { %v1609_v32 = vsub.f32 %v1592_v49, %v1529_v23  ;;  %v1586_v43 = vmul.f32 0.6931472, %v2007_v20  ;;  %v1498_v49 = vld [vmem:[#allocation5 + $0x78] sm:$0xff] }
 0x30e   :  { %1639 = vst.msk [vmem:[%s3153_s6 + $0x60] sm:$0xff] %vm28_vm3, %v1623_v56  ;;  %v2025_v56 = vld [vmem:[%s3151_s4 + $0x58] sm:$0xff]  ;;  %v1514_v50 = vmul.f32 %v1498_v49, %v1482_v51 }
 0x30f   :  { %v1625_v59 = vmul.f32 %v2023_v24, %v1609_v32 }
 0x311   :  { %1641 = vst.msk [vmem:[%s3153_s6 + $0x70] sm:$0xff] %vm28_vm3, %v1625_v59 }
 0x32c   :  { %v1222_v33 = vpop.xlane.xlu1 %1221 }
 0x32d   :  { %v1238_v8 = vadd.f32 %v1222_v33, %v1174_v41 }
 0x32f   :  { %1255 = vst.msk [vmem:[#allocation3 + $0x78] sm:$0xff] %vm28_vm3, %v1238_v8 }
 0x330   :  { %v1218_v30 = vpop.xlane.xlu1 %1217 }
 0x331   :  { %v1236_v7 = vadd.f32 %v1218_v30, %v1172_v53 }
 0x333   :  { %1253 = vst.msk [vmem:[#allocation3 + $0x68] sm:$0xff] %vm28_vm3, %v1236_v7 }
 0x334   :  { %v1307_v16 = vpop.xlane.xlu1 %1306 }
 0x335   :  { %v1329_v35 = vadd.f32 %v1307_v16, %v1265_v5 }
 0x336   :  { %v1546_v40 = vld [vmem:[#allocation3 + $0x78] sm:$0xff] }
 0x337   :  { %1345 = vst.msk [vmem:[#allocation4 + $0x48] sm:$0xff] %vm28_vm3, %v1329_v35  ;;  %v1562_v18 = vadd.f32 1e-10, %v1546_v40 }
 0x338   :  { %v1311_v62 = vpop.xlane.xlu1 %1310 }
 0x339   :  { %v1331_v57 = vadd.f32 %v1311_v62, %v1267_v27 }
 0x33a   :  { %v1544_v52 = vld [vmem:[#allocation3 + $0x68] sm:$0xff] }
 0x33b   :  { %v1560_v19 = vadd.f32 1e-10, %v1544_v52  ;;  %1347 = vst.msk [vmem:[#allocation4 + $0x58] sm:$0xff] %vm28_vm3, %v1331_v57 }
 0x33c   :  { %v1315_v25 = vpop.xlane.xlu1 %1314 }
 0x33d   :  { %2008 = vlog2.f32 %v1560_v19  ;;  %v1333_v13 = vadd.f32 %v1315_v25, %v1269_v29 }
 0x33e   :  { %2010 = vlog2.f32 %v1562_v18  ;;  %v1460_v61 = vld [vmem:[#allocation4 + $0x48] sm:$0xff] }
 0x33f   :  { %v1524_v31 = vsub.f32 %v1460_v61, %v1508_v58  ;;  %1349 = vst.msk [vmem:[#allocation4 + $0x68] sm:$0xff] %vm28_vm3, %v1333_v13 }
 0x340   :  { %v1319_v1 = vpop.xlane.xlu1 %1318 }
 0x341   :  { %v1604_v34 = vsub.f32 %v1582_v39, %v1524_v31  ;;  %v1335_v17 = vadd.f32 %v1319_v1, %v1271_v11 }
 0x342   :  { %v1462_v22 = vld [vmem:[#allocation4 + $0x58] sm:$0xff] }
 0x343   :  { %v1620_v47 = vmul.f32 %v2024_v2, %v1604_v34  ;;  %v1526_v42 = vsub.f32 %v1462_v22, %v1510_v9  ;;  %1351 = vst.msk [vmem:[#allocation4 + $0x78] sm:$0xff] %vm28_vm3, %v1335_v17 }
 0x345   :  { %1636 = vst.msk [vmem:[%s3153_s6 + $0x48] sm:$0xff] %vm28_vm3, %v1620_v47  ;;  %v1606_v46 = vsub.f32 %v1586_v43, %v1526_v42 }
 0x346   :  { %v1464_v23 = vld [vmem:[#allocation4 + $0x68] sm:$0xff] }
 0x347   :  { %v2009_v48 = vpop.eup %2008  ;;  %v1622_v32 = vmul.f32 %v2025_v56, %v1606_v46  ;;  %v1528_v24 = vsub.f32 %v1464_v23, %v1512_v14 }
 0x348   :  { %v2011_v59 = vpop.eup %2010  ;;  %v1590_v28 = vmul.f32 0.6931472, %v2009_v48 }
 0x349   :  { %1638 = vst.msk [vmem:[%s3153_s6 + $0x58] sm:$0xff] %vm28_vm3, %v1622_v32  ;;  %v1594_v4 = vmul.f32 0.6931472, %v2011_v59 }
 0x34a   :  { %v1608_v36 = vsub.f32 %v1590_v28, %v1528_v24  ;;  %v1466_v3 = vld [vmem:[#allocation4 + $0x78] sm:$0xff] }
 0x34b   :  { %v1530_v63 = vsub.f32 %v1466_v3, %v1514_v50 }
 0x34c   :  { %v1624_v45 = vmul.f32 %v2026_v15, %v1608_v36 }
 0x34d   :  { %v1610_v41 = vsub.f32 %v1594_v4, %v1530_v63 }
 0x34e   :  { %1640 = vst.msk [vmem:[%s3153_s6 + $0x68] sm:$0xff] %vm28_vm3, %v1624_v45 }
 0x34f   :  { %v1626_v33 = vmul.f32 %v2027_v10, %v1610_v41 }
 0x351   :  { %1642 = vst.msk [vmem:[%s3153_s6 + $0x78] sm:$0xff] %vm28_vm3, %v1626_v33 }

</bundles_post_ra>
